<compile_context>
chip_gen: v7x
topology: tpu7x:2x2x1
jax: 0.10.0
libtpu: 0.0.40
codegen_flags: <defaults>
</compile_context>

<pallas_src>
import functools

import jax
import jax.numpy as jnp
from jax.experimental import pallas as pl
from jax.experimental.pallas import tpu as pltpu

HIDDEN = 32      # hidden_layer_size (small for the synthetic test)
LAYERS = 3       # layer_num
MAX_ACTION = 1.0 # forced to 1.0 in __init__


def actor_v3_kernel(x_ref,
                    wih0_ref, whh0_ref, b0_ref,
                    wih1_ref, whh1_ref, b1_ref,
                    wih2_ref, whh2_ref, b2_ref,
                    wmu_ref, bmu_ref,
                    out_ref,
                    hseq_ref,          # VMEM scratch (T*B, H): inter-layer sequence
                    *, B, T):
    H = whh0_ref.shape[0]

    layer_params = (
        (wih0_ref, whh0_ref, b0_ref),
        (wih1_ref, whh1_ref, b1_ref),
        (wih2_ref, whh2_ref, b2_ref),
    )

    # Time-major flattened input: row index = t*B + b.
    x_in = x_ref[...]                                  # (T*B, D_in)

    h = jnp.zeros((B, H), jnp.float32)
    c = jnp.zeros((B, H), jnp.float32)

    # state is None in the reference path -> h0 = c0 = 0 for every layer.
    for li, (wih_ref, whh_ref, b_ref) in enumerate(layer_params):
        wih_t = wih_ref[...]                           # (D_in, 4H)  -- hoisted loads
        whh_t = whh_ref[...]                           # (H, 4H)
        b = b_ref[...]                                 # (1, 4H)

        # (perf) ONE batched input projection per layer, bias folded in.
        xg = jnp.dot(x_in, wih_t,
                     preferred_element_type=jnp.float32) + b      # (T*B, 4H)

        h = jnp.zeros((B, H), jnp.float32)
        c = jnp.zeros((B, H), jnp.float32)
        last = li == len(layer_params) - 1

        # Static unroll: T=8, and with the precompute the per-step live set is a
        # handful of vregs, so no spill risk; static slices keep lowering simple.
        for t in range(T):
            gates = xg[t * B:(t + 1) * B, :] + jnp.dot(
                h, whh_t, preferred_element_type=jnp.float32)     # (B, 4H)

            # (perf) fused activations: 2 full-vreg EUP ops, then 32-lane slices.
            sig = jax.nn.sigmoid(gates)
            th = jnp.tanh(gates)
            i_g = sig[:, 0 * H:1 * H]
            f_g = sig[:, 1 * H:2 * H]
            g_g = th[:, 2 * H:3 * H]
            o_g = sig[:, 3 * H:4 * H]

            c = f_g * c + i_g * g_g
            h = o_g * jnp.tanh(c)

            if not last:
                # (perf) write the step output straight into VMEM scratch
                # (plain vst at a static row offset; no jnp.stack relayout).
                hseq_ref[pl.ds(t * B, B), :] = h

        if not last:
            x_in = hseq_ref[...]                       # (T*B, H) feeds the next layer

    # logits = obs[:, -1]  == h at the final timestep of the top LSTM layer.
    mu = jnp.dot(h, wmu_ref[...], preferred_element_type=jnp.float32) + bmu_ref[...]
    mu = MAX_ACTION * jnp.tanh(mu)                     # unbounded=False path

    # TODO(synk): sigma (sigma_param.exp() broadcast) is computed but unused in the
    # PyTorch forward (it returns only mu), so it is omitted here.
    out_ref[...] = mu.astype(out_ref.dtype)


def actor_v3_forward(obs, params):
    """obs: (B, T, D) or (B, D) float32. Returns mu: (B, A)."""
    if obs.ndim == 2:
        obs = obs[:, None, :]                          # unsqueeze(-2): (B, 1, D)
    obs = obs.astype(jnp.float32)
    B, T, D = obs.shape
    A = params["wmu_t"].shape[1]
    H = params["whh0_t"].shape[0]

    # Time-major flattening so row (t*B + b) feeds one batched input projection
    # per layer inside the kernel.
    obs_tb = jnp.transpose(obs, (1, 0, 2)).reshape(T * B, D)

    inputs = (
        obs_tb,
        params["wih0_t"], params["whh0_t"], params["b0"],
        params["wih1_t"], params["whh1_t"], params["b1"],
        params["wih2_t"], params["whh2_t"], params["b2"],
        params["wmu_t"], params["bmu"],
    )

    vmem = pl.BlockSpec(memory_space=pltpu.MemorySpace.VMEM)
    # No grid: everything fits trivially in VMEM at these shapes.
    # TODO(synk): for production batches (B >= 16) add a grid over B with
    # dimension_semantics=("parallel",) so v7x's second TensorCore is used.
    return pl.pallas_call(
        functools.partial(actor_v3_kernel, B=B, T=T),
        out_shape=jax.ShapeDtypeStruct((B, A), jnp.float32),
        in_specs=[vmem] * len(inputs),
        out_specs=vmem,
        scratch_shapes=[pltpu.VMEM((T * B, H), jnp.float32)],
    )(*inputs)


def init_params(key, obs_dim, action_dim, hidden=HIDDEN):
    """Deterministic init; mirrors PyTorch LSTM/Linear uniform(-1/sqrt(H), 1/sqrt(H))."""
    ks = jax.random.split(key, 16)
    bound = 1.0 / jnp.sqrt(hidden)

    def u(k, shape):
        return jax.random.uniform(k, shape, jnp.float32, -bound, bound)

    params = {}
    in_dims = [obs_dim, hidden, hidden]
    for l in range(LAYERS):
        wih = u(ks[4 * l + 0], (4 * hidden, in_dims[l]))   # PyTorch weight_ih_l{l}
        whh = u(ks[4 * l + 1], (4 * hidden, hidden))       # PyTorch weight_hh_l{l}
        bih = u(ks[4 * l + 2], (4 * hidden,))
        bhh = u(ks[4 * l + 3], (4 * hidden,))
        params[f"wih{l}_t"] = wih.T                         # (D_in, 4H)
        params[f"whh{l}_t"] = whh.T                         # (H, 4H)
        params[f"b{l}"] = (bih + bhh)[None, :]              # (1, 4H)

    wmu = u(ks[12], (action_dim, hidden))
    bmu = u(ks[13], (action_dim,))
    params["wmu_t"] = wmu.T            # (H, A)
    params["bmu"] = bmu[None, :]       # (1, A)
    return params


def _reference_forward(obs, params, hidden=HIDDEN):
    """Pure-JAX reference (PyTorch LSTM semantics, i/f/g/o gate order)."""
    if obs.ndim == 2:
        obs = obs[:, None, :]
    B, T, _ = obs.shape
    x_seq = obs.astype(jnp.float32)
    H = hidden
    for l in range(LAYERS):
        wih_t, whh_t, b = params[f"wih{l}_t"], params[f"whh{l}_t"], params[f"b{l}"]
        h = jnp.zeros((B, H), jnp.float32)
        c = jnp.zeros((B, H), jnp.float32)
        outs = []
        for t in range(T):
            gates = x_seq[:, t, :] @ wih_t + h @ whh_t + b
            i = jax.nn.sigmoid(gates[:, 0 * H:1 * H])
            f = jax.nn.sigmoid(gates[:, 1 * H:2 * H])
            g = jnp.tanh(gates[:, 2 * H:3 * H])
            o = jax.nn.sigmoid(gates[:, 3 * H:4 * H])
            c = f * c + i * g
            h = o * jnp.tanh(c)
            outs.append(h)
        x_seq = jnp.stack(outs, axis=1)
    logits = x_seq[:, -1, :]
    mu = logits @ params["wmu_t"] + params["bmu"]
    return MAX_ACTION * jnp.tanh(mu)


if __name__ == "__main__":
    B, T, OBS_DIM, ACTION_DIM = 2, 8, 16, 4

    root = jax.random.PRNGKey(0)
    k_obs, k_par = jax.random.split(root)
    obs = jax.random.normal(k_obs, (B, T, OBS_DIM), jnp.float32)
    params = init_params(k_par, OBS_DIM, ACTION_DIM)

    mu = actor_v3_forward(obs, params)
    mu = jax.block_until_ready(mu)

    mu_ref = _reference_forward(obs, params)
    assert mu.shape == (B, ACTION_DIM)
    assert jnp.allclose(mu, mu_ref, atol=1e-5, rtol=1e-5), "mismatch vs reference"

    print("KERNEL_OK")
</pallas_src>

<mosaic_0001>
module attributes {stable_mosaic.version = 11 : i64} {
  func.func @actor_v3_kernel(%arg0: memref<16x16xf32, #tpu.memory_space<vmem>>, %arg1: memref<16x128xf32, #tpu.memory_space<vmem>>, %arg2: memref<32x128xf32, #tpu.memory_space<vmem>>, %arg3: memref<1x128xf32, #tpu.memory_space<vmem>>, %arg4: memref<32x128xf32, #tpu.memory_space<vmem>>, %arg5: memref<32x128xf32, #tpu.memory_space<vmem>>, %arg6: memref<1x128xf32, #tpu.memory_space<vmem>>, %arg7: memref<32x128xf32, #tpu.memory_space<vmem>>, %arg8: memref<32x128xf32, #tpu.memory_space<vmem>>, %arg9: memref<1x128xf32, #tpu.memory_space<vmem>>, %arg10: memref<32x4xf32, #tpu.memory_space<vmem>>, %arg11: memref<1x4xf32, #tpu.memory_space<vmem>>, %arg12: memref<2x4xf32, #tpu.memory_space<vmem>>, %arg13: memref<16x32xf32, #tpu.memory_space<vmem>>) attributes {dimension_semantics = [], scalar_prefetch = 0 : i64, scratch_operands = 1 : i64, tpu.core_type = #tpu.core_type<tc>} {
    %c0 = arith.constant 0 : index
    %c0_0 = arith.constant 0 : index
    %0 = vector.load %arg0[%c0, %c0_0] : memref<16x16xf32, #tpu.memory_space<vmem>>, vector<16x16xf32>
    %c0_1 = arith.constant 0 : index
    %c0_2 = arith.constant 0 : index
    %1 = vector.load %arg1[%c0_1, %c0_2] : memref<16x128xf32, #tpu.memory_space<vmem>>, vector<16x128xf32>
    %c0_3 = arith.constant 0 : index
    %c0_4 = arith.constant 0 : index
    %2 = vector.load %arg2[%c0_3, %c0_4] : memref<32x128xf32, #tpu.memory_space<vmem>>, vector<32x128xf32>
    %c0_5 = arith.constant 0 : index
    %c0_6 = arith.constant 0 : index
    %3 = vector.load %arg3[%c0_5, %c0_6] : memref<1x128xf32, #tpu.memory_space<vmem>>, vector<1x128xf32>
    %cst = arith.constant dense<0.000000e+00> : vector<16x128xf32>
    %4 = tpu.matmul %0, %1, %cst {dimension_numbers = #tpu.dot_dimension_numbers<[1], [0], [0], [1], [0, 0, 1, 1], [], []>} : vector<16x16xf32>, vector<16x128xf32>, vector<16x128xf32> -> vector<16x128xf32>
    %5 = vector.broadcast %3 : vector<1x128xf32> to vector<16x128xf32>
    %6 = arith.addf %4, %5 : vector<16x128xf32>
    %cst_7 = arith.constant 0.000000e+00 : f32
    %7 = vector.broadcast %cst_7 : f32 to vector<2x32xf32>
    %cst_8 = arith.constant 0.000000e+00 : f32
    %8 = vector.broadcast %cst_8 : f32 to vector<2x32xf32>
    %9 = vector.extract_strided_slice %6 {offsets = [0, 0], sizes = [2, 128], strides = [1, 1]} : vector<16x128xf32> to vector<2x128xf32>
    %cst_9 = arith.constant dense<0.000000e+00> : vector<2x128xf32>
    %10 = tpu.matmul %7, %2, %cst_9 {dimension_numbers = #tpu.dot_dimension_numbers<[1], [0], [0], [1], [0, 0, 1, 1], [], []>} : vector<2x32xf32>, vector<32x128xf32>, vector<2x128xf32> -> vector<2x128xf32>
    %11 = arith.addf %9, %10 : vector<2x128xf32>
    %12 = arith.negf %11 : vector<2x128xf32>
    %13 = math.exp %12 : vector<2x128xf32>
    %cst_10 = arith.constant 1.000000e+00 : f32
    %14 = vector.broadcast %cst_10 : f32 to vector<2x128xf32>
    %15 = arith.addf %14, %13 : vector<2x128xf32>
    %16 = arith.divf %14, %15 : vector<2x128xf32>
    %17 = math.tanh %11 : vector<2x128xf32>
    %18 = vector.extract_strided_slice %16 {offsets = [0, 0], sizes = [2, 32], strides = [1, 1]} : vector<2x128xf32> to vector<2x32xf32>
    %19 = vector.extract_strided_slice %16 {offsets = [0, 32], sizes = [2, 32], strides = [1, 1]} : vector<2x128xf32> to vector<2x32xf32>
    %20 = vector.extract_strided_slice %17 {offsets = [0, 64], sizes = [2, 32], strides = [1, 1]} : vector<2x128xf32> to vector<2x32xf32>
    %21 = vector.extract_strided_slice %16 {offsets = [0, 96], sizes = [2, 32], strides = [1, 1]} : vector<2x128xf32> to vector<2x32xf32>
    %22 = arith.mulf %19, %8 : vector<2x32xf32>
    %23 = arith.mulf %18, %20 : vector<2x32xf32>
    %24 = arith.addf %22, %23 : vector<2x32xf32>
    %25 = math.tanh %24 : vector<2x32xf32>
    %26 = arith.mulf %21, %25 : vector<2x32xf32>
    %c0_11 = arith.constant 0 : index
    %c0_12 = arith.constant 0 : index
    %27 = vector.load %arg13[%c0_11, %c0_12] : memref<16x32xf32, #tpu.memory_space<vmem>>, vector<2x32xf32>
    tpu.vector_store %arg13[%c0_11, %c0_12], %26 {strides = array<i32>} : memref<16x32xf32, #tpu.memory_space<vmem>>, vector<2x32xf32>,
    %28 = vector.extract_strided_slice %6 {offsets = [2, 0], sizes = [2, 128], strides = [1, 1]} : vector<16x128xf32> to vector<2x128xf32>
    %cst_13 = arith.constant dense<0.000000e+00> : vector<2x128xf32>
    %29 = tpu.matmul %26, %2, %cst_13 {dimension_numbers = #tpu.dot_dimension_numbers<[1], [0], [0], [1], [0, 0, 1, 1], [], []>} : vector<2x32xf32>, vector<32x128xf32>, vector<2x128xf32> -> vector<2x128xf32>
    %30 = arith.addf %28, %29 : vector<2x128xf32>
    %31 = arith.negf %30 : vector<2x128xf32>
    %32 = math.exp %31 : vector<2x128xf32>
    %cst_14 = arith.constant 1.000000e+00 : f32
    %33 = vector.broadcast %cst_14 : f32 to vector<2x128xf32>
    %34 = arith.addf %33, %32 : vector<2x128xf32>
    %35 = arith.divf %33, %34 : vector<2x128xf32>
    %36 = math.tanh %30 : vector<2x128xf32>
    %37 = vector.extract_strided_slice %35 {offsets = [0, 0], sizes = [2, 32], strides = [1, 1]} : vector<2x128xf32> to vector<2x32xf32>
    %38 = vector.extract_strided_slice %35 {offsets = [0, 32], sizes = [2, 32], strides = [1, 1]} : vector<2x128xf32> to vector<2x32xf32>
    %39 = vector.extract_strided_slice %36 {offsets = [0, 64], sizes = [2, 32], strides = [1, 1]} : vector<2x128xf32> to vector<2x32xf32>
    %40 = vector.extract_strided_slice %35 {offsets = [0, 96], sizes = [2, 32], strides = [1, 1]} : vector<2x128xf32> to vector<2x32xf32>
    %41 = arith.mulf %38, %24 : vector<2x32xf32>
    %42 = arith.mulf %37, %39 : vector<2x32xf32>
    %43 = arith.addf %41, %42 : vector<2x32xf32>
    %44 = math.tanh %43 : vector<2x32xf32>
    %45 = arith.mulf %40, %44 : vector<2x32xf32>
    %c2 = arith.constant 2 : index
    %c0_15 = arith.constant 0 : index
    %46 = vector.load %arg13[%c2, %c0_15] : memref<16x32xf32, #tpu.memory_space<vmem>>, vector<2x32xf32>
    tpu.vector_store %arg13[%c2, %c0_15], %45 {strides = array<i32>} : memref<16x32xf32, #tpu.memory_space<vmem>>, vector<2x32xf32>,
    %47 = vector.extract_strided_slice %6 {offsets = [4, 0], sizes = [2, 128], strides = [1, 1]} : vector<16x128xf32> to vector<2x128xf32>
    %cst_16 = arith.constant dense<0.000000e+00> : vector<2x128xf32>
    %48 = tpu.matmul %45, %2, %cst_16 {dimension_numbers = #tpu.dot_dimension_numbers<[1], [0], [0], [1], [0, 0, 1, 1], [], []>} : vector<2x32xf32>, vector<32x128xf32>, vector<2x128xf32> -> vector<2x128xf32>
    %49 = arith.addf %47, %48 : vector<2x128xf32>
    %50 = arith.negf %49 : vector<2x128xf32>
    %51 = math.exp %50 : vector<2x128xf32>
    %cst_17 = arith.constant 1.000000e+00 : f32
    %52 = vector.broadcast %cst_17 : f32 to vector<2x128xf32>
    %53 = arith.addf %52, %51 : vector<2x128xf32>
    %54 = arith.divf %52, %53 : vector<2x128xf32>
    %55 = math.tanh %49 : vector<2x128xf32>
    %56 = vector.extract_strided_slice %54 {offsets = [0, 0], sizes = [2, 32], strides = [1, 1]} : vector<2x128xf32> to vector<2x32xf32>
    %57 = vector.extract_strided_slice %54 {offsets = [0, 32], sizes = [2, 32], strides = [1, 1]} : vector<2x128xf32> to vector<2x32xf32>
    %58 = vector.extract_strided_slice %55 {offsets = [0, 64], sizes = [2, 32], strides = [1, 1]} : vector<2x128xf32> to vector<2x32xf32>
    %59 = vector.extract_strided_slice %54 {offsets = [0, 96], sizes = [2, 32], strides = [1, 1]} : vector<2x128xf32> to vector<2x32xf32>
    %60 = arith.mulf %57, %43 : vector<2x32xf32>
    %61 = arith.mulf %56, %58 : vector<2x32xf32>
    %62 = arith.addf %60, %61 : vector<2x32xf32>
    %63 = math.tanh %62 : vector<2x32xf32>
    %64 = arith.mulf %59, %63 : vector<2x32xf32>
    %c4 = arith.constant 4 : index
    %c0_18 = arith.constant 0 : index
    %65 = vector.load %arg13[%c4, %c0_18] : memref<16x32xf32, #tpu.memory_space<vmem>>, vector<2x32xf32>
    tpu.vector_store %arg13[%c4, %c0_18], %64 {strides = array<i32>} : memref<16x32xf32, #tpu.memory_space<vmem>>, vector<2x32xf32>,
    %66 = vector.extract_strided_slice %6 {offsets = [6, 0], sizes = [2, 128], strides = [1, 1]} : vector<16x128xf32> to vector<2x128xf32>
    %cst_19 = arith.constant dense<0.000000e+00> : vector<2x128xf32>
    %67 = tpu.matmul %64, %2, %cst_19 {dimension_numbers = #tpu.dot_dimension_numbers<[1], [0], [0], [1], [0, 0, 1, 1], [], []>} : vector<2x32xf32>, vector<32x128xf32>, vector<2x128xf32> -> vector<2x128xf32>
    %68 = arith.addf %66, %67 : vector<2x128xf32>
    %69 = arith.negf %68 : vector<2x128xf32>
    %70 = math.exp %69 : vector<2x128xf32>
    %cst_20 = arith.constant 1.000000e+00 : f32
    %71 = vector.broadcast %cst_20 : f32 to vector<2x128xf32>
    %72 = arith.addf %71, %70 : vector<2x128xf32>
    %73 = arith.divf %71, %72 : vector<2x128xf32>
    %74 = math.tanh %68 : vector<2x128xf32>
    %75 = vector.extract_strided_slice %73 {offsets = [0, 0], sizes = [2, 32], strides = [1, 1]} : vector<2x128xf32> to vector<2x32xf32>
    %76 = vector.extract_strided_slice %73 {offsets = [0, 32], sizes = [2, 32], strides = [1, 1]} : vector<2x128xf32> to vector<2x32xf32>
    %77 = vector.extract_strided_slice %74 {offsets = [0, 64], sizes = [2, 32], strides = [1, 1]} : vector<2x128xf32> to vector<2x32xf32>
    %78 = vector.extract_strided_slice %73 {offsets = [0, 96], sizes = [2, 32], strides = [1, 1]} : vector<2x128xf32> to vector<2x32xf32>
    %79 = arith.mulf %76, %62 : vector<2x32xf32>
    %80 = arith.mulf %75, %77 : vector<2x32xf32>
    %81 = arith.addf %79, %80 : vector<2x32xf32>
    %82 = math.tanh %81 : vector<2x32xf32>
    %83 = arith.mulf %78, %82 : vector<2x32xf32>
    %c6 = arith.constant 6 : index
    %c0_21 = arith.constant 0 : index
    %84 = vector.load %arg13[%c6, %c0_21] : memref<16x32xf32, #tpu.memory_space<vmem>>, vector<2x32xf32>
    tpu.vector_store %arg13[%c6, %c0_21], %83 {strides = array<i32>} : memref<16x32xf32, #tpu.memory_space<vmem>>, vector<2x32xf32>,
    %85 = vector.extract_strided_slice %6 {offsets = [8, 0], sizes = [2, 128], strides = [1, 1]} : vector<16x128xf32> to vector<2x128xf32>
    %cst_22 = arith.constant dense<0.000000e+00> : vector<2x128xf32>
    %86 = tpu.matmul %83, %2, %cst_22 {dimension_numbers = #tpu.dot_dimension_numbers<[1], [0], [0], [1], [0, 0, 1, 1], [], []>} : vector<2x32xf32>, vector<32x128xf32>, vector<2x128xf32> -> vector<2x128xf32>
    %87 = arith.addf %85, %86 : vector<2x128xf32>
    %88 = arith.negf %87 : vector<2x128xf32>
    %89 = math.exp %88 : vector<2x128xf32>
    %cst_23 = arith.constant 1.000000e+00 : f32
    %90 = vector.broadcast %cst_23 : f32 to vector<2x128xf32>
    %91 = arith.addf %90, %89 : vector<2x128xf32>
    %92 = arith.divf %90, %91 : vector<2x128xf32>
    %93 = math.tanh %87 : vector<2x128xf32>
    %94 = vector.extract_strided_slice %92 {offsets = [0, 0], sizes = [2, 32], strides = [1, 1]} : vector<2x128xf32> to vector<2x32xf32>
    %95 = vector.extract_strided_slice %92 {offsets = [0, 32], sizes = [2, 32], strides = [1, 1]} : vector<2x128xf32> to vector<2x32xf32>
    %96 = vector.extract_strided_slice %93 {offsets = [0, 64], sizes = [2, 32], strides = [1, 1]} : vector<2x128xf32> to vector<2x32xf32>
    %97 = vector.extract_strided_slice %92 {offsets = [0, 96], sizes = [2, 32], strides = [1, 1]} : vector<2x128xf32> to vector<2x32xf32>
    %98 = arith.mulf %95, %81 : vector<2x32xf32>
    %99 = arith.mulf %94, %96 : vector<2x32xf32>
    %100 = arith.addf %98, %99 : vector<2x32xf32>
    %101 = math.tanh %100 : vector<2x32xf32>
    %102 = arith.mulf %97, %101 : vector<2x32xf32>
    %c8 = arith.constant 8 : index
    %c0_24 = arith.constant 0 : index
    %103 = vector.load %arg13[%c8, %c0_24] : memref<16x32xf32, #tpu.memory_space<vmem>>, vector<2x32xf32>
    tpu.vector_store %arg13[%c8, %c0_24], %102 {strides = array<i32>} : memref<16x32xf32, #tpu.memory_space<vmem>>, vector<2x32xf32>,
    %104 = vector.extract_strided_slice %6 {offsets = [10, 0], sizes = [2, 128], strides = [1, 1]} : vector<16x128xf32> to vector<2x128xf32>
    %cst_25 = arith.constant dense<0.000000e+00> : vector<2x128xf32>
    %105 = tpu.matmul %102, %2, %cst_25 {dimension_numbers = #tpu.dot_dimension_numbers<[1], [0], [0], [1], [0, 0, 1, 1], [], []>} : vector<2x32xf32>, vector<32x128xf32>, vector<2x128xf32> -> vector<2x128xf32>
    %106 = arith.addf %104, %105 : vector<2x128xf32>
    %107 = arith.negf %106 : vector<2x128xf32>
    %108 = math.exp %107 : vector<2x128xf32>
    %cst_26 = arith.constant 1.000000e+00 : f32
    %109 = vector.broadcast %cst_26 : f32 to vector<2x128xf32>
    %110 = arith.addf %109, %108 : vector<2x128xf32>
    %111 = arith.divf %109, %110 : vector<2x128xf32>
    %112 = math.tanh %106 : vector<2x128xf32>
    %113 = vector.extract_strided_slice %111 {offsets = [0, 0], sizes = [2, 32], strides = [1, 1]} : vector<2x128xf32> to vector<2x32xf32>
    %114 = vector.extract_strided_slice %111 {offsets = [0, 32], sizes = [2, 32], strides = [1, 1]} : vector<2x128xf32> to vector<2x32xf32>
    %115 = vector.extract_strided_slice %112 {offsets = [0, 64], sizes = [2, 32], strides = [1, 1]} : vector<2x128xf32> to vector<2x32xf32>
    %116 = vector.extract_strided_slice %111 {offsets = [0, 96], sizes = [2, 32], strides = [1, 1]} : vector<2x128xf32> to vector<2x32xf32>
    %117 = arith.mulf %114, %100 : vector<2x32xf32>
    %118 = arith.mulf %113, %115 : vector<2x32xf32>
    %119 = arith.addf %117, %118 : vector<2x32xf32>
    %120 = math.tanh %119 : vector<2x32xf32>
    %121 = arith.mulf %116, %120 : vector<2x32xf32>
    %c10 = arith.constant 10 : index
    %c0_27 = arith.constant 0 : index
    %122 = vector.load %arg13[%c10, %c0_27] : memref<16x32xf32, #tpu.memory_space<vmem>>, vector<2x32xf32>
    tpu.vector_store %arg13[%c10, %c0_27], %121 {strides = array<i32>} : memref<16x32xf32, #tpu.memory_space<vmem>>, vector<2x32xf32>,
    %123 = vector.extract_strided_slice %6 {offsets = [12, 0], sizes = [2, 128], strides = [1, 1]} : vector<16x128xf32> to vector<2x128xf32>
    %cst_28 = arith.constant dense<0.000000e+00> : vector<2x128xf32>
    %124 = tpu.matmul %121, %2, %cst_28 {dimension_numbers = #tpu.dot_dimension_numbers<[1], [0], [0], [1], [0, 0, 1, 1], [], []>} : vector<2x32xf32>, vector<32x128xf32>, vector<2x128xf32> -> vector<2x128xf32>
    %125 = arith.addf %123, %124 : vector<2x128xf32>
    %126 = arith.negf %125 : vector<2x128xf32>
    %127 = math.exp %126 : vector<2x128xf32>
    %cst_29 = arith.constant 1.000000e+00 : f32
    %128 = vector.broadcast %cst_29 : f32 to vector<2x128xf32>
    %129 = arith.addf %128, %127 : vector<2x128xf32>
    %130 = arith.divf %128, %129 : vector<2x128xf32>
    %131 = math.tanh %125 : vector<2x128xf32>
    %132 = vector.extract_strided_slice %130 {offsets = [0, 0], sizes = [2, 32], strides = [1, 1]} : vector<2x128xf32> to vector<2x32xf32>
    %133 = vector.extract_strided_slice %130 {offsets = [0, 32], sizes = [2, 32], strides = [1, 1]} : vector<2x128xf32> to vector<2x32xf32>
    %134 = vector.extract_strided_slice %131 {offsets = [0, 64], sizes = [2, 32], strides = [1, 1]} : vector<2x128xf32> to vector<2x32xf32>
    %135 = vector.extract_strided_slice %130 {offsets = [0, 96], sizes = [2, 32], strides = [1, 1]} : vector<2x128xf32> to vector<2x32xf32>
    %136 = arith.mulf %133, %119 : vector<2x32xf32>
    %137 = arith.mulf %132, %134 : vector<2x32xf32>
    %138 = arith.addf %136, %137 : vector<2x32xf32>
    %139 = math.tanh %138 : vector<2x32xf32>
    %140 = arith.mulf %135, %139 : vector<2x32xf32>
    %c12 = arith.constant 12 : index
    %c0_30 = arith.constant 0 : index
    %141 = vector.load %arg13[%c12, %c0_30] : memref<16x32xf32, #tpu.memory_space<vmem>>, vector<2x32xf32>
    tpu.vector_store %arg13[%c12, %c0_30], %140 {strides = array<i32>} : memref<16x32xf32, #tpu.memory_space<vmem>>, vector<2x32xf32>,
    %142 = vector.extract_strided_slice %6 {offsets = [14, 0], sizes = [2, 128], strides = [1, 1]} : vector<16x128xf32> to vector<2x128xf32>
    %cst_31 = arith.constant dense<0.000000e+00> : vector<2x128xf32>
    %143 = tpu.matmul %140, %2, %cst_31 {dimension_numbers = #tpu.dot_dimension_numbers<[1], [0], [0], [1], [0, 0, 1, 1], [], []>} : vector<2x32xf32>, vector<32x128xf32>, vector<2x128xf32> -> vector<2x128xf32>
    %144 = arith.addf %142, %143 : vector<2x128xf32>
    %145 = arith.negf %144 : vector<2x128xf32>
    %146 = math.exp %145 : vector<2x128xf32>
    %cst_32 = arith.constant 1.000000e+00 : f32
    %147 = vector.broadcast %cst_32 : f32 to vector<2x128xf32>
    %148 = arith.addf %147, %146 : vector<2x128xf32>
    %149 = arith.divf %147, %148 : vector<2x128xf32>
    %150 = math.tanh %144 : vector<2x128xf32>
    %151 = vector.extract_strided_slice %149 {offsets = [0, 0], sizes = [2, 32], strides = [1, 1]} : vector<2x128xf32> to vector<2x32xf32>
    %152 = vector.extract_strided_slice %149 {offsets = [0, 32], sizes = [2, 32], strides = [1, 1]} : vector<2x128xf32> to vector<2x32xf32>
    %153 = vector.extract_strided_slice %150 {offsets = [0, 64], sizes = [2, 32], strides = [1, 1]} : vector<2x128xf32> to vector<2x32xf32>
    %154 = vector.extract_strided_slice %149 {offsets = [0, 96], sizes = [2, 32], strides = [1, 1]} : vector<2x128xf32> to vector<2x32xf32>
    %155 = arith.mulf %152, %138 : vector<2x32xf32>
    %156 = arith.mulf %151, %153 : vector<2x32xf32>
    %157 = arith.addf %155, %156 : vector<2x32xf32>
    %158 = math.tanh %157 : vector<2x32xf32>
    %159 = arith.mulf %154, %158 : vector<2x32xf32>
    %c14 = arith.constant 14 : index
    %c0_33 = arith.constant 0 : index
    %160 = vector.load %arg13[%c14, %c0_33] : memref<16x32xf32, #tpu.memory_space<vmem>>, vector<2x32xf32>
    tpu.vector_store %arg13[%c14, %c0_33], %159 {strides = array<i32>} : memref<16x32xf32, #tpu.memory_space<vmem>>, vector<2x32xf32>,
    %c0_34 = arith.constant 0 : index
    %c0_35 = arith.constant 0 : index
    %161 = vector.load %arg13[%c0_34, %c0_35] : memref<16x32xf32, #tpu.memory_space<vmem>>, vector<16x32xf32>
    %c0_36 = arith.constant 0 : index
    %c0_37 = arith.constant 0 : index
    %162 = vector.load %arg4[%c0_36, %c0_37] : memref<32x128xf32, #tpu.memory_space<vmem>>, vector<32x128xf32>
    %c0_38 = arith.constant 0 : index
    %c0_39 = arith.constant 0 : index
    %163 = vector.load %arg5[%c0_38, %c0_39] : memref<32x128xf32, #tpu.memory_space<vmem>>, vector<32x128xf32>
    %c0_40 = arith.constant 0 : index
    %c0_41 = arith.constant 0 : index
    %164 = vector.load %arg6[%c0_40, %c0_41] : memref<1x128xf32, #tpu.memory_space<vmem>>, vector<1x128xf32>
    %cst_42 = arith.constant dense<0.000000e+00> : vector<16x128xf32>
    %165 = tpu.matmul %161, %162, %cst_42 {dimension_numbers = #tpu.dot_dimension_numbers<[1], [0], [0], [1], [0, 0, 1, 1], [], []>} : vector<16x32xf32>, vector<32x128xf32>, vector<16x128xf32> -> vector<16x128xf32>
    %166 = vector.broadcast %164 : vector<1x128xf32> to vector<16x128xf32>
    %167 = arith.addf %165, %166 : vector<16x128xf32>
    %cst_43 = arith.constant 0.000000e+00 : f32
    %168 = vector.broadcast %cst_43 : f32 to vector<2x32xf32>
    %cst_44 = arith.constant 0.000000e+00 : f32
    %169 = vector.broadcast %cst_44 : f32 to vector<2x32xf32>
    %170 = vector.extract_strided_slice %167 {offsets = [0, 0], sizes = [2, 128], strides = [1, 1]} : vector<16x128xf32> to vector<2x128xf32>
    %cst_45 = arith.constant dense<0.000000e+00> : vector<2x128xf32>
    %171 = tpu.matmul %168, %163, %cst_45 {dimension_numbers = #tpu.dot_dimension_numbers<[1], [0], [0], [1], [0, 0, 1, 1], [], []>} : vector<2x32xf32>, vector<32x128xf32>, vector<2x128xf32> -> vector<2x128xf32>
    %172 = arith.addf %170, %171 : vector<2x128xf32>
    %173 = arith.negf %172 : vector<2x128xf32>
    %174 = math.exp %173 : vector<2x128xf32>
    %cst_46 = arith.constant 1.000000e+00 : f32
    %175 = vector.broadcast %cst_46 : f32 to vector<2x128xf32>
    %176 = arith.addf %175, %174 : vector<2x128xf32>
    %177 = arith.divf %175, %176 : vector<2x128xf32>
    %178 = math.tanh %172 : vector<2x128xf32>
    %179 = vector.extract_strided_slice %177 {offsets = [0, 0], sizes = [2, 32], strides = [1, 1]} : vector<2x128xf32> to vector<2x32xf32>
    %180 = vector.extract_strided_slice %177 {offsets = [0, 32], sizes = [2, 32], strides = [1, 1]} : vector<2x128xf32> to vector<2x32xf32>
    %181 = vector.extract_strided_slice %178 {offsets = [0, 64], sizes = [2, 32], strides = [1, 1]} : vector<2x128xf32> to vector<2x32xf32>
    %182 = vector.extract_strided_slice %177 {offsets = [0, 96], sizes = [2, 32], strides = [1, 1]} : vector<2x128xf32> to vector<2x32xf32>
    %183 = arith.mulf %180, %169 : vector<2x32xf32>
    %184 = arith.mulf %179, %181 : vector<2x32xf32>
    %185 = arith.addf %183, %184 : vector<2x32xf32>
    %186 = math.tanh %185 : vector<2x32xf32>
    %187 = arith.mulf %182, %186 : vector<2x32xf32>
    %c0_47 = arith.constant 0 : index
    %c0_48 = arith.constant 0 : index
    %188 = vector.load %arg13[%c0_47, %c0_48] : memref<16x32xf32, #tpu.memory_space<vmem>>, vector<2x32xf32>
    tpu.vector_store %arg13[%c0_47, %c0_48], %187 {strides = array<i32>} : memref<16x32xf32, #tpu.memory_space<vmem>>, vector<2x32xf32>,
    %189 = vector.extract_strided_slice %167 {offsets = [2, 0], sizes = [2, 128], strides = [1, 1]} : vector<16x128xf32> to vector<2x128xf32>
    %cst_49 = arith.constant dense<0.000000e+00> : vector<2x128xf32>
    %190 = tpu.matmul %187, %163, %cst_49 {dimension_numbers = #tpu.dot_dimension_numbers<[1], [0], [0], [1], [0, 0, 1, 1], [], []>} : vector<2x32xf32>, vector<32x128xf32>, vector<2x128xf32> -> vector<2x128xf32>
    %191 = arith.addf %189, %190 : vector<2x128xf32>
    %192 = arith.negf %191 : vector<2x128xf32>
    %193 = math.exp %192 : vector<2x128xf32>
    %cst_50 = arith.constant 1.000000e+00 : f32
    %194 = vector.broadcast %cst_50 : f32 to vector<2x128xf32>
    %195 = arith.addf %194, %193 : vector<2x128xf32>
    %196 = arith.divf %194, %195 : vector<2x128xf32>
    %197 = math.tanh %191 : vector<2x128xf32>
    %198 = vector.extract_strided_slice %196 {offsets = [0, 0], sizes = [2, 32], strides = [1, 1]} : vector<2x128xf32> to vector<2x32xf32>
    %199 = vector.extract_strided_slice %196 {offsets = [0, 32], sizes = [2, 32], strides = [1, 1]} : vector<2x128xf32> to vector<2x32xf32>
    %200 = vector.extract_strided_slice %197 {offsets = [0, 64], sizes = [2, 32], strides = [1, 1]} : vector<2x128xf32> to vector<2x32xf32>
    %201 = vector.extract_strided_slice %196 {offsets = [0, 96], sizes = [2, 32], strides = [1, 1]} : vector<2x128xf32> to vector<2x32xf32>
    %202 = arith.mulf %199, %185 : vector<2x32xf32>
    %203 = arith.mulf %198, %200 : vector<2x32xf32>
    %204 = arith.addf %202, %203 : vector<2x32xf32>
    %205 = math.tanh %204 : vector<2x32xf32>
    %206 = arith.mulf %201, %205 : vector<2x32xf32>
    %c2_51 = arith.constant 2 : index
    %c0_52 = arith.constant 0 : index
    %207 = vector.load %arg13[%c2_51, %c0_52] : memref<16x32xf32, #tpu.memory_space<vmem>>, vector<2x32xf32>
    tpu.vector_store %arg13[%c2_51, %c0_52], %206 {strides = array<i32>} : memref<16x32xf32, #tpu.memory_space<vmem>>, vector<2x32xf32>,
    %208 = vector.extract_strided_slice %167 {offsets = [4, 0], sizes = [2, 128], strides = [1, 1]} : vector<16x128xf32> to vector<2x128xf32>
    %cst_53 = arith.constant dense<0.000000e+00> : vector<2x128xf32>
    %209 = tpu.matmul %206, %163, %cst_53 {dimension_numbers = #tpu.dot_dimension_numbers<[1], [0], [0], [1], [0, 0, 1, 1], [], []>} : vector<2x32xf32>, vector<32x128xf32>, vector<2x128xf32> -> vector<2x128xf32>
    %210 = arith.addf %208, %209 : vector<2x128xf32>
    %211 = arith.negf %210 : vector<2x128xf32>
    %212 = math.exp %211 : vector<2x128xf32>
    %cst_54 = arith.constant 1.000000e+00 : f32
    %213 = vector.broadcast %cst_54 : f32 to vector<2x128xf32>
    %214 = arith.addf %213, %212 : vector<2x128xf32>
    %215 = arith.divf %213, %214 : vector<2x128xf32>
    %216 = math.tanh %210 : vector<2x128xf32>
    %217 = vector.extract_strided_slice %215 {offsets = [0, 0], sizes = [2, 32], strides = [1, 1]} : vector<2x128xf32> to vector<2x32xf32>
    %218 = vector.extract_strided_slice %215 {offsets = [0, 32], sizes = [2, 32], strides = [1, 1]} : vector<2x128xf32> to vector<2x32xf32>
    %219 = vector.extract_strided_slice %216 {offsets = [0, 64], sizes = [2, 32], strides = [1, 1]} : vector<2x128xf32> to vector<2x32xf32>
    %220 = vector.extract_strided_slice %215 {offsets = [0, 96], sizes = [2, 32], strides = [1, 1]} : vector<2x128xf32> to vector<2x32xf32>
    %221 = arith.mulf %218, %204 : vector<2x32xf32>
    %222 = arith.mulf %217, %219 : vector<2x32xf32>
    %223 = arith.addf %221, %222 : vector<2x32xf32>
    %224 = math.tanh %223 : vector<2x32xf32>
    %225 = arith.mulf %220, %224 : vector<2x32xf32>
    %c4_55 = arith.constant 4 : index
    %c0_56 = arith.constant 0 : index
    %226 = vector.load %arg13[%c4_55, %c0_56] : memref<16x32xf32, #tpu.memory_space<vmem>>, vector<2x32xf32>
    tpu.vector_store %arg13[%c4_55, %c0_56], %225 {strides = array<i32>} : memref<16x32xf32, #tpu.memory_space<vmem>>, vector<2x32xf32>,
    %227 = vector.extract_strided_slice %167 {offsets = [6, 0], sizes = [2, 128], strides = [1, 1]} : vector<16x128xf32> to vector<2x128xf32>
    %cst_57 = arith.constant dense<0.000000e+00> : vector<2x128xf32>
    %228 = tpu.matmul %225, %163, %cst_57 {dimension_numbers = #tpu.dot_dimension_numbers<[1], [0], [0], [1], [0, 0, 1, 1], [], []>} : vector<2x32xf32>, vector<32x128xf32>, vector<2x128xf32> -> vector<2x128xf32>
    %229 = arith.addf %227, %228 : vector<2x128xf32>
    %230 = arith.negf %229 : vector<2x128xf32>
    %231 = math.exp %230 : vector<2x128xf32>
    %cst_58 = arith.constant 1.000000e+00 : f32
    %232 = vector.broadcast %cst_58 : f32 to vector<2x128xf32>
    %233 = arith.addf %232, %231 : vector<2x128xf32>
    %234 = arith.divf %232, %233 : vector<2x128xf32>
    %235 = math.tanh %229 : vector<2x128xf32>
    %236 = vector.extract_strided_slice %234 {offsets = [0, 0], sizes = [2, 32], strides = [1, 1]} : vector<2x128xf32> to vector<2x32xf32>
    %237 = vector.extract_strided_slice %234 {offsets = [0, 32], sizes = [2, 32], strides = [1, 1]} : vector<2x128xf32> to vector<2x32xf32>
    %238 = vector.extract_strided_slice %235 {offsets = [0, 64], sizes = [2, 32], strides = [1, 1]} : vector<2x128xf32> to vector<2x32xf32>
    %239 = vector.extract_strided_slice %234 {offsets = [0, 96], sizes = [2, 32], strides = [1, 1]} : vector<2x128xf32> to vector<2x32xf32>
    %240 = arith.mulf %237, %223 : vector<2x32xf32>
    %241 = arith.mulf %236, %238 : vector<2x32xf32>
    %242 = arith.addf %240, %241 : vector<2x32xf32>
    %243 = math.tanh %242 : vector<2x32xf32>
    %244 = arith.mulf %239, %243 : vector<2x32xf32>
    %c6_59 = arith.constant 6 : index
    %c0_60 = arith.constant 0 : index
    %245 = vector.load %arg13[%c6_59, %c0_60] : memref<16x32xf32, #tpu.memory_space<vmem>>, vector<2x32xf32>
    tpu.vector_store %arg13[%c6_59, %c0_60], %244 {strides = array<i32>} : memref<16x32xf32, #tpu.memory_space<vmem>>, vector<2x32xf32>,
    %246 = vector.extract_strided_slice %167 {offsets = [8, 0], sizes = [2, 128], strides = [1, 1]} : vector<16x128xf32> to vector<2x128xf32>
    %cst_61 = arith.constant dense<0.000000e+00> : vector<2x128xf32>
    %247 = tpu.matmul %244, %163, %cst_61 {dimension_numbers = #tpu.dot_dimension_numbers<[1], [0], [0], [1], [0, 0, 1, 1], [], []>} : vector<2x32xf32>, vector<32x128xf32>, vector<2x128xf32> -> vector<2x128xf32>
    %248 = arith.addf %246, %247 : vector<2x128xf32>
    %249 = arith.negf %248 : vector<2x128xf32>
    %250 = math.exp %249 : vector<2x128xf32>
    %cst_62 = arith.constant 1.000000e+00 : f32
    %251 = vector.broadcast %cst_62 : f32 to vector<2x128xf32>
    %252 = arith.addf %251, %250 : vector<2x128xf32>
    %253 = arith.divf %251, %252 : vector<2x128xf32>
    %254 = math.tanh %248 : vector<2x128xf32>
    %255 = vector.extract_strided_slice %253 {offsets = [0, 0], sizes = [2, 32], strides = [1, 1]} : vector<2x128xf32> to vector<2x32xf32>
    %256 = vector.extract_strided_slice %253 {offsets = [0, 32], sizes = [2, 32], strides = [1, 1]} : vector<2x128xf32> to vector<2x32xf32>
    %257 = vector.extract_strided_slice %254 {offsets = [0, 64], sizes = [2, 32], strides = [1, 1]} : vector<2x128xf32> to vector<2x32xf32>
    %258 = vector.extract_strided_slice %253 {offsets = [0, 96], sizes = [2, 32], strides = [1, 1]} : vector<2x128xf32> to vector<2x32xf32>
    %259 = arith.mulf %256, %242 : vector<2x32xf32>
    %260 = arith.mulf %255, %257 : vector<2x32xf32>
    %261 = arith.addf %259, %260 : vector<2x32xf32>
    %262 = math.tanh %261 : vector<2x32xf32>
    %263 = arith.mulf %258, %262 : vector<2x32xf32>
    %c8_63 = arith.constant 8 : index
    %c0_64 = arith.constant 0 : index
    %264 = vector.load %arg13[%c8_63, %c0_64] : memref<16x32xf32, #tpu.memory_space<vmem>>, vector<2x32xf32>
    tpu.vector_store %arg13[%c8_63, %c0_64], %263 {strides = array<i32>} : memref<16x32xf32, #tpu.memory_space<vmem>>, vector<2x32xf32>,
    %265 = vector.extract_strided_slice %167 {offsets = [10, 0], sizes = [2, 128], strides = [1, 1]} : vector<16x128xf32> to vector<2x128xf32>
    %cst_65 = arith.constant dense<0.000000e+00> : vector<2x128xf32>
    %266 = tpu.matmul %263, %163, %cst_65 {dimension_numbers = #tpu.dot_dimension_numbers<[1], [0], [0], [1], [0, 0, 1, 1], [], []>} : vector<2x32xf32>, vector<32x128xf32>, vector<2x128xf32> -> vector<2x128xf32>
    %267 = arith.addf %265, %266 : vector<2x128xf32>
    %268 = arith.negf %267 : vector<2x128xf32>
    %269 = math.exp %268 : vector<2x128xf32>
    %cst_66 = arith.constant 1.000000e+00 : f32
    %270 = vector.broadcast %cst_66 : f32 to vector<2x128xf32>
    %271 = arith.addf %270, %269 : vector<2x128xf32>
    %272 = arith.divf %270, %271 : vector<2x128xf32>
    %273 = math.tanh %267 : vector<2x128xf32>
    %274 = vector.extract_strided_slice %272 {offsets = [0, 0], sizes = [2, 32], strides = [1, 1]} : vector<2x128xf32> to vector<2x32xf32>
    %275 = vector.extract_strided_slice %272 {offsets = [0, 32], sizes = [2, 32], strides = [1, 1]} : vector<2x128xf32> to vector<2x32xf32>
    %276 = vector.extract_strided_slice %273 {offsets = [0, 64], sizes = [2, 32], strides = [1, 1]} : vector<2x128xf32> to vector<2x32xf32>
    %277 = vector.extract_strided_slice %272 {offsets = [0, 96], sizes = [2, 32], strides = [1, 1]} : vector<2x128xf32> to vector<2x32xf32>
    %278 = arith.mulf %275, %261 : vector<2x32xf32>
    %279 = arith.mulf %274, %276 : vector<2x32xf32>
    %280 = arith.addf %278, %279 : vector<2x32xf32>
    %281 = math.tanh %280 : vector<2x32xf32>
    %282 = arith.mulf %277, %281 : vector<2x32xf32>
    %c10_67 = arith.constant 10 : index
    %c0_68 = arith.constant 0 : index
    %283 = vector.load %arg13[%c10_67, %c0_68] : memref<16x32xf32, #tpu.memory_space<vmem>>, vector<2x32xf32>
    tpu.vector_store %arg13[%c10_67, %c0_68], %282 {strides = array<i32>} : memref<16x32xf32, #tpu.memory_space<vmem>>, vector<2x32xf32>,
    %284 = vector.extract_strided_slice %167 {offsets = [12, 0], sizes = [2, 128], strides = [1, 1]} : vector<16x128xf32> to vector<2x128xf32>
    %cst_69 = arith.constant dense<0.000000e+00> : vector<2x128xf32>
    %285 = tpu.matmul %282, %163, %cst_69 {dimension_numbers = #tpu.dot_dimension_numbers<[1], [0], [0], [1], [0, 0, 1, 1], [], []>} : vector<2x32xf32>, vector<32x128xf32>, vector<2x128xf32> -> vector<2x128xf32>
    %286 = arith.addf %284, %285 : vector<2x128xf32>
    %287 = arith.negf %286 : vector<2x128xf32>
    %288 = math.exp %287 : vector<2x128xf32>
    %cst_70 = arith.constant 1.000000e+00 : f32
    %289 = vector.broadcast %cst_70 : f32 to vector<2x128xf32>
    %290 = arith.addf %289, %288 : vector<2x128xf32>
    %291 = arith.divf %289, %290 : vector<2x128xf32>
    %292 = math.tanh %286 : vector<2x128xf32>
    %293 = vector.extract_strided_slice %291 {offsets = [0, 0], sizes = [2, 32], strides = [1, 1]} : vector<2x128xf32> to vector<2x32xf32>
    %294 = vector.extract_strided_slice %291 {offsets = [0, 32], sizes = [2, 32], strides = [1, 1]} : vector<2x128xf32> to vector<2x32xf32>
    %295 = vector.extract_strided_slice %292 {offsets = [0, 64], sizes = [2, 32], strides = [1, 1]} : vector<2x128xf32> to vector<2x32xf32>
    %296 = vector.extract_strided_slice %291 {offsets = [0, 96], sizes = [2, 32], strides = [1, 1]} : vector<2x128xf32> to vector<2x32xf32>
    %297 = arith.mulf %294, %280 : vector<2x32xf32>
    %298 = arith.mulf %293, %295 : vector<2x32xf32>
    %299 = arith.addf %297, %298 : vector<2x32xf32>
    %300 = math.tanh %299 : vector<2x32xf32>
    %301 = arith.mulf %296, %300 : vector<2x32xf32>
    %c12_71 = arith.constant 12 : index
    %c0_72 = arith.constant 0 : index
    %302 = vector.load %arg13[%c12_71, %c0_72] : memref<16x32xf32, #tpu.memory_space<vmem>>, vector<2x32xf32>
    tpu.vector_store %arg13[%c12_71, %c0_72], %301 {strides = array<i32>} : memref<16x32xf32, #tpu.memory_space<vmem>>, vector<2x32xf32>,
    %303 = vector.extract_strided_slice %167 {offsets = [14, 0], sizes = [2, 128], strides = [1, 1]} : vector<16x128xf32> to vector<2x128xf32>
    %cst_73 = arith.constant dense<0.000000e+00> : vector<2x128xf32>
    %304 = tpu.matmul %301, %163, %cst_73 {dimension_numbers = #tpu.dot_dimension_numbers<[1], [0], [0], [1], [0, 0, 1, 1], [], []>} : vector<2x32xf32>, vector<32x128xf32>, vector<2x128xf32> -> vector<2x128xf32>
    %305 = arith.addf %303, %304 : vector<2x128xf32>
    %306 = arith.negf %305 : vector<2x128xf32>
    %307 = math.exp %306 : vector<2x128xf32>
    %cst_74 = arith.constant 1.000000e+00 : f32
    %308 = vector.broadcast %cst_74 : f32 to vector<2x128xf32>
    %309 = arith.addf %308, %307 : vector<2x128xf32>
    %310 = arith.divf %308, %309 : vector<2x128xf32>
    %311 = math.tanh %305 : vector<2x128xf32>
    %312 = vector.extract_strided_slice %310 {offsets = [0, 0], sizes = [2, 32], strides = [1, 1]} : vector<2x128xf32> to vector<2x32xf32>
    %313 = vector.extract_strided_slice %310 {offsets = [0, 32], sizes = [2, 32], strides = [1, 1]} : vector<2x128xf32> to vector<2x32xf32>
    %314 = vector.extract_strided_slice %311 {offsets = [0, 64], sizes = [2, 32], strides = [1, 1]} : vector<2x128xf32> to vector<2x32xf32>
    %315 = vector.extract_strided_slice %310 {offsets = [0, 96], sizes = [2, 32], strides = [1, 1]} : vector<2x128xf32> to vector<2x32xf32>
    %316 = arith.mulf %313, %299 : vector<2x32xf32>
    %317 = arith.mulf %312, %314 : vector<2x32xf32>
    %318 = arith.addf %316, %317 : vector<2x32xf32>
    %319 = math.tanh %318 : vector<2x32xf32>
    %320 = arith.mulf %315, %319 : vector<2x32xf32>
    %c14_75 = arith.constant 14 : index
    %c0_76 = arith.constant 0 : index
    %321 = vector.load %arg13[%c14_75, %c0_76] : memref<16x32xf32, #tpu.memory_space<vmem>>, vector<2x32xf32>
    tpu.vector_store %arg13[%c14_75, %c0_76], %320 {strides = array<i32>} : memref<16x32xf32, #tpu.memory_space<vmem>>, vector<2x32xf32>,
    %c0_77 = arith.constant 0 : index
    %c0_78 = arith.constant 0 : index
    %322 = vector.load %arg13[%c0_77, %c0_78] : memref<16x32xf32, #tpu.memory_space<vmem>>, vector<16x32xf32>
    %c0_79 = arith.constant 0 : index
    %c0_80 = arith.constant 0 : index
    %323 = vector.load %arg7[%c0_79, %c0_80] : memref<32x128xf32, #tpu.memory_space<vmem>>, vector<32x128xf32>
    %c0_81 = arith.constant 0 : index
    %c0_82 = arith.constant 0 : index
    %324 = vector.load %arg8[%c0_81, %c0_82] : memref<32x128xf32, #tpu.memory_space<vmem>>, vector<32x128xf32>
    %c0_83 = arith.constant 0 : index
    %c0_84 = arith.constant 0 : index
    %325 = vector.load %arg9[%c0_83, %c0_84] : memref<1x128xf32, #tpu.memory_space<vmem>>, vector<1x128xf32>
    %cst_85 = arith.constant dense<0.000000e+00> : vector<16x128xf32>
    %326 = tpu.matmul %322, %323, %cst_85 {dimension_numbers = #tpu.dot_dimension_numbers<[1], [0], [0], [1], [0, 0, 1, 1], [], []>} : vector<16x32xf32>, vector<32x128xf32>, vector<16x128xf32> -> vector<16x128xf32>
    %327 = vector.broadcast %325 : vector<1x128xf32> to vector<16x128xf32>
    %328 = arith.addf %326, %327 : vector<16x128xf32>
    %cst_86 = arith.constant 0.000000e+00 : f32
    %329 = vector.broadcast %cst_86 : f32 to vector<2x32xf32>
    %cst_87 = arith.constant 0.000000e+00 : f32
    %330 = vector.broadcast %cst_87 : f32 to vector<2x32xf32>
    %331 = vector.extract_strided_slice %328 {offsets = [0, 0], sizes = [2, 128], strides = [1, 1]} : vector<16x128xf32> to vector<2x128xf32>
    %cst_88 = arith.constant dense<0.000000e+00> : vector<2x128xf32>
    %332 = tpu.matmul %329, %324, %cst_88 {dimension_numbers = #tpu.dot_dimension_numbers<[1], [0], [0], [1], [0, 0, 1, 1], [], []>} : vector<2x32xf32>, vector<32x128xf32>, vector<2x128xf32> -> vector<2x128xf32>
    %333 = arith.addf %331, %332 : vector<2x128xf32>
    %334 = arith.negf %333 : vector<2x128xf32>
    %335 = math.exp %334 : vector<2x128xf32>
    %cst_89 = arith.constant 1.000000e+00 : f32
    %336 = vector.broadcast %cst_89 : f32 to vector<2x128xf32>
    %337 = arith.addf %336, %335 : vector<2x128xf32>
    %338 = arith.divf %336, %337 : vector<2x128xf32>
    %339 = math.tanh %333 : vector<2x128xf32>
    %340 = vector.extract_strided_slice %338 {offsets = [0, 0], sizes = [2, 32], strides = [1, 1]} : vector<2x128xf32> to vector<2x32xf32>
    %341 = vector.extract_strided_slice %338 {offsets = [0, 32], sizes = [2, 32], strides = [1, 1]} : vector<2x128xf32> to vector<2x32xf32>
    %342 = vector.extract_strided_slice %339 {offsets = [0, 64], sizes = [2, 32], strides = [1, 1]} : vector<2x128xf32> to vector<2x32xf32>
    %343 = vector.extract_strided_slice %338 {offsets = [0, 96], sizes = [2, 32], strides = [1, 1]} : vector<2x128xf32> to vector<2x32xf32>
    %344 = arith.mulf %341, %330 : vector<2x32xf32>
    %345 = arith.mulf %340, %342 : vector<2x32xf32>
    %346 = arith.addf %344, %345 : vector<2x32xf32>
    %347 = math.tanh %346 : vector<2x32xf32>
    %348 = arith.mulf %343, %347 : vector<2x32xf32>
    %349 = vector.extract_strided_slice %328 {offsets = [2, 0], sizes = [2, 128], strides = [1, 1]} : vector<16x128xf32> to vector<2x128xf32>
    %cst_90 = arith.constant dense<0.000000e+00> : vector<2x128xf32>
    %350 = tpu.matmul %348, %324, %cst_90 {dimension_numbers = #tpu.dot_dimension_numbers<[1], [0], [0], [1], [0, 0, 1, 1], [], []>} : vector<2x32xf32>, vector<32x128xf32>, vector<2x128xf32> -> vector<2x128xf32>
    %351 = arith.addf %349, %350 : vector<2x128xf32>
    %352 = arith.negf %351 : vector<2x128xf32>
    %353 = math.exp %352 : vector<2x128xf32>
    %cst_91 = arith.constant 1.000000e+00 : f32
    %354 = vector.broadcast %cst_91 : f32 to vector<2x128xf32>
    %355 = arith.addf %354, %353 : vector<2x128xf32>
    %356 = arith.divf %354, %355 : vector<2x128xf32>
    %357 = math.tanh %351 : vector<2x128xf32>
    %358 = vector.extract_strided_slice %356 {offsets = [0, 0], sizes = [2, 32], strides = [1, 1]} : vector<2x128xf32> to vector<2x32xf32>
    %359 = vector.extract_strided_slice %356 {offsets = [0, 32], sizes = [2, 32], strides = [1, 1]} : vector<2x128xf32> to vector<2x32xf32>
    %360 = vector.extract_strided_slice %357 {offsets = [0, 64], sizes = [2, 32], strides = [1, 1]} : vector<2x128xf32> to vector<2x32xf32>
    %361 = vector.extract_strided_slice %356 {offsets = [0, 96], sizes = [2, 32], strides = [1, 1]} : vector<2x128xf32> to vector<2x32xf32>
    %362 = arith.mulf %359, %346 : vector<2x32xf32>
    %363 = arith.mulf %358, %360 : vector<2x32xf32>
    %364 = arith.addf %362, %363 : vector<2x32xf32>
    %365 = math.tanh %364 : vector<2x32xf32>
    %366 = arith.mulf %361, %365 : vector<2x32xf32>
    %367 = vector.extract_strided_slice %328 {offsets = [4, 0], sizes = [2, 128], strides = [1, 1]} : vector<16x128xf32> to vector<2x128xf32>
    %cst_92 = arith.constant dense<0.000000e+00> : vector<2x128xf32>
    %368 = tpu.matmul %366, %324, %cst_92 {dimension_numbers = #tpu.dot_dimension_numbers<[1], [0], [0], [1], [0, 0, 1, 1], [], []>} : vector<2x32xf32>, vector<32x128xf32>, vector<2x128xf32> -> vector<2x128xf32>
    %369 = arith.addf %367, %368 : vector<2x128xf32>
    %370 = arith.negf %369 : vector<2x128xf32>
    %371 = math.exp %370 : vector<2x128xf32>
    %cst_93 = arith.constant 1.000000e+00 : f32
    %372 = vector.broadcast %cst_93 : f32 to vector<2x128xf32>
    %373 = arith.addf %372, %371 : vector<2x128xf32>
    %374 = arith.divf %372, %373 : vector<2x128xf32>
    %375 = math.tanh %369 : vector<2x128xf32>
    %376 = vector.extract_strided_slice %374 {offsets = [0, 0], sizes = [2, 32], strides = [1, 1]} : vector<2x128xf32> to vector<2x32xf32>
    %377 = vector.extract_strided_slice %374 {offsets = [0, 32], sizes = [2, 32], strides = [1, 1]} : vector<2x128xf32> to vector<2x32xf32>
    %378 = vector.extract_strided_slice %375 {offsets = [0, 64], sizes = [2, 32], strides = [1, 1]} : vector<2x128xf32> to vector<2x32xf32>
    %379 = vector.extract_strided_slice %374 {offsets = [0, 96], sizes = [2, 32], strides = [1, 1]} : vector<2x128xf32> to vector<2x32xf32>
    %380 = arith.mulf %377, %364 : vector<2x32xf32>
    %381 = arith.mulf %376, %378 : vector<2x32xf32>
    %382 = arith.addf %380, %381 : vector<2x32xf32>
    %383 = math.tanh %382 : vector<2x32xf32>
    %384 = arith.mulf %379, %383 : vector<2x32xf32>
    %385 = vector.extract_strided_slice %328 {offsets = [6, 0], sizes = [2, 128], strides = [1, 1]} : vector<16x128xf32> to vector<2x128xf32>
    %cst_94 = arith.constant dense<0.000000e+00> : vector<2x128xf32>
    %386 = tpu.matmul %384, %324, %cst_94 {dimension_numbers = #tpu.dot_dimension_numbers<[1], [0], [0], [1], [0, 0, 1, 1], [], []>} : vector<2x32xf32>, vector<32x128xf32>, vector<2x128xf32> -> vector<2x128xf32>
    %387 = arith.addf %385, %386 : vector<2x128xf32>
    %388 = arith.negf %387 : vector<2x128xf32>
    %389 = math.exp %388 : vector<2x128xf32>
    %cst_95 = arith.constant 1.000000e+00 : f32
    %390 = vector.broadcast %cst_95 : f32 to vector<2x128xf32>
    %391 = arith.addf %390, %389 : vector<2x128xf32>
    %392 = arith.divf %390, %391 : vector<2x128xf32>
    %393 = math.tanh %387 : vector<2x128xf32>
    %394 = vector.extract_strided_slice %392 {offsets = [0, 0], sizes = [2, 32], strides = [1, 1]} : vector<2x128xf32> to vector<2x32xf32>
    %395 = vector.extract_strided_slice %392 {offsets = [0, 32], sizes = [2, 32], strides = [1, 1]} : vector<2x128xf32> to vector<2x32xf32>
    %396 = vector.extract_strided_slice %393 {offsets = [0, 64], sizes = [2, 32], strides = [1, 1]} : vector<2x128xf32> to vector<2x32xf32>
    %397 = vector.extract_strided_slice %392 {offsets = [0, 96], sizes = [2, 32], strides = [1, 1]} : vector<2x128xf32> to vector<2x32xf32>
    %398 = arith.mulf %395, %382 : vector<2x32xf32>
    %399 = arith.mulf %394, %396 : vector<2x32xf32>
    %400 = arith.addf %398, %399 : vector<2x32xf32>
    %401 = math.tanh %400 : vector<2x32xf32>
    %402 = arith.mulf %397, %401 : vector<2x32xf32>
    %403 = vector.extract_strided_slice %328 {offsets = [8, 0], sizes = [2, 128], strides = [1, 1]} : vector<16x128xf32> to vector<2x128xf32>
    %cst_96 = arith.constant dense<0.000000e+00> : vector<2x128xf32>
    %404 = tpu.matmul %402, %324, %cst_96 {dimension_numbers = #tpu.dot_dimension_numbers<[1], [0], [0], [1], [0, 0, 1, 1], [], []>} : vector<2x32xf32>, vector<32x128xf32>, vector<2x128xf32> -> vector<2x128xf32>
    %405 = arith.addf %403, %404 : vector<2x128xf32>
    %406 = arith.negf %405 : vector<2x128xf32>
    %407 = math.exp %406 : vector<2x128xf32>
    %cst_97 = arith.constant 1.000000e+00 : f32
    %408 = vector.broadcast %cst_97 : f32 to vector<2x128xf32>
    %409 = arith.addf %408, %407 : vector<2x128xf32>
    %410 = arith.divf %408, %409 : vector<2x128xf32>
    %411 = math.tanh %405 : vector<2x128xf32>
    %412 = vector.extract_strided_slice %410 {offsets = [0, 0], sizes = [2, 32], strides = [1, 1]} : vector<2x128xf32> to vector<2x32xf32>
    %413 = vector.extract_strided_slice %410 {offsets = [0, 32], sizes = [2, 32], strides = [1, 1]} : vector<2x128xf32> to vector<2x32xf32>
    %414 = vector.extract_strided_slice %411 {offsets = [0, 64], sizes = [2, 32], strides = [1, 1]} : vector<2x128xf32> to vector<2x32xf32>
    %415 = vector.extract_strided_slice %410 {offsets = [0, 96], sizes = [2, 32], strides = [1, 1]} : vector<2x128xf32> to vector<2x32xf32>
    %416 = arith.mulf %413, %400 : vector<2x32xf32>
    %417 = arith.mulf %412, %414 : vector<2x32xf32>
    %418 = arith.addf %416, %417 : vector<2x32xf32>
    %419 = math.tanh %418 : vector<2x32xf32>
    %420 = arith.mulf %415, %419 : vector<2x32xf32>
    %421 = vector.extract_strided_slice %328 {offsets = [10, 0], sizes = [2, 128], strides = [1, 1]} : vector<16x128xf32> to vector<2x128xf32>
    %cst_98 = arith.constant dense<0.000000e+00> : vector<2x128xf32>
    %422 = tpu.matmul %420, %324, %cst_98 {dimension_numbers = #tpu.dot_dimension_numbers<[1], [0], [0], [1], [0, 0, 1, 1], [], []>} : vector<2x32xf32>, vector<32x128xf32>, vector<2x128xf32> -> vector<2x128xf32>
    %423 = arith.addf %421, %422 : vector<2x128xf32>
    %424 = arith.negf %423 : vector<2x128xf32>
    %425 = math.exp %424 : vector<2x128xf32>
    %cst_99 = arith.constant 1.000000e+00 : f32
    %426 = vector.broadcast %cst_99 : f32 to vector<2x128xf32>
    %427 = arith.addf %426, %425 : vector<2x128xf32>
    %428 = arith.divf %426, %427 : vector<2x128xf32>
    %429 = math.tanh %423 : vector<2x128xf32>
    %430 = vector.extract_strided_slice %428 {offsets = [0, 0], sizes = [2, 32], strides = [1, 1]} : vector<2x128xf32> to vector<2x32xf32>
    %431 = vector.extract_strided_slice %428 {offsets = [0, 32], sizes = [2, 32], strides = [1, 1]} : vector<2x128xf32> to vector<2x32xf32>
    %432 = vector.extract_strided_slice %429 {offsets = [0, 64], sizes = [2, 32], strides = [1, 1]} : vector<2x128xf32> to vector<2x32xf32>
    %433 = vector.extract_strided_slice %428 {offsets = [0, 96], sizes = [2, 32], strides = [1, 1]} : vector<2x128xf32> to vector<2x32xf32>
    %434 = arith.mulf %431, %418 : vector<2x32xf32>
    %435 = arith.mulf %430, %432 : vector<2x32xf32>
    %436 = arith.addf %434, %435 : vector<2x32xf32>
    %437 = math.tanh %436 : vector<2x32xf32>
    %438 = arith.mulf %433, %437 : vector<2x32xf32>
    %439 = vector.extract_strided_slice %328 {offsets = [12, 0], sizes = [2, 128], strides = [1, 1]} : vector<16x128xf32> to vector<2x128xf32>
    %cst_100 = arith.constant dense<0.000000e+00> : vector<2x128xf32>
    %440 = tpu.matmul %438, %324, %cst_100 {dimension_numbers = #tpu.dot_dimension_numbers<[1], [0], [0], [1], [0, 0, 1, 1], [], []>} : vector<2x32xf32>, vector<32x128xf32>, vector<2x128xf32> -> vector<2x128xf32>
    %441 = arith.addf %439, %440 : vector<2x128xf32>
    %442 = arith.negf %441 : vector<2x128xf32>
    %443 = math.exp %442 : vector<2x128xf32>
    %cst_101 = arith.constant 1.000000e+00 : f32
    %444 = vector.broadcast %cst_101 : f32 to vector<2x128xf32>
    %445 = arith.addf %444, %443 : vector<2x128xf32>
    %446 = arith.divf %444, %445 : vector<2x128xf32>
    %447 = math.tanh %441 : vector<2x128xf32>
    %448 = vector.extract_strided_slice %446 {offsets = [0, 0], sizes = [2, 32], strides = [1, 1]} : vector<2x128xf32> to vector<2x32xf32>
    %449 = vector.extract_strided_slice %446 {offsets = [0, 32], sizes = [2, 32], strides = [1, 1]} : vector<2x128xf32> to vector<2x32xf32>
    %450 = vector.extract_strided_slice %447 {offsets = [0, 64], sizes = [2, 32], strides = [1, 1]} : vector<2x128xf32> to vector<2x32xf32>
    %451 = vector.extract_strided_slice %446 {offsets = [0, 96], sizes = [2, 32], strides = [1, 1]} : vector<2x128xf32> to vector<2x32xf32>
    %452 = arith.mulf %449, %436 : vector<2x32xf32>
    %453 = arith.mulf %448, %450 : vector<2x32xf32>
    %454 = arith.addf %452, %453 : vector<2x32xf32>
    %455 = math.tanh %454 : vector<2x32xf32>
    %456 = arith.mulf %451, %455 : vector<2x32xf32>
    %457 = vector.extract_strided_slice %328 {offsets = [14, 0], sizes = [2, 128], strides = [1, 1]} : vector<16x128xf32> to vector<2x128xf32>
    %cst_102 = arith.constant dense<0.000000e+00> : vector<2x128xf32>
    %458 = tpu.matmul %456, %324, %cst_102 {dimension_numbers = #tpu.dot_dimension_numbers<[1], [0], [0], [1], [0, 0, 1, 1], [], []>} : vector<2x32xf32>, vector<32x128xf32>, vector<2x128xf32> -> vector<2x128xf32>
    %459 = arith.addf %457, %458 : vector<2x128xf32>
    %460 = arith.negf %459 : vector<2x128xf32>
    %461 = math.exp %460 : vector<2x128xf32>
    %cst_103 = arith.constant 1.000000e+00 : f32
    %462 = vector.broadcast %cst_103 : f32 to vector<2x128xf32>
    %463 = arith.addf %462, %461 : vector<2x128xf32>
    %464 = arith.divf %462, %463 : vector<2x128xf32>
    %465 = math.tanh %459 : vector<2x128xf32>
    %466 = vector.extract_strided_slice %464 {offsets = [0, 0], sizes = [2, 32], strides = [1, 1]} : vector<2x128xf32> to vector<2x32xf32>
    %467 = vector.extract_strided_slice %464 {offsets = [0, 32], sizes = [2, 32], strides = [1, 1]} : vector<2x128xf32> to vector<2x32xf32>
    %468 = vector.extract_strided_slice %465 {offsets = [0, 64], sizes = [2, 32], strides = [1, 1]} : vector<2x128xf32> to vector<2x32xf32>
    %469 = vector.extract_strided_slice %464 {offsets = [0, 96], sizes = [2, 32], strides = [1, 1]} : vector<2x128xf32> to vector<2x32xf32>
    %470 = arith.mulf %467, %454 : vector<2x32xf32>
    %471 = arith.mulf %466, %468 : vector<2x32xf32>
    %472 = arith.addf %470, %471 : vector<2x32xf32>
    %473 = math.tanh %472 : vector<2x32xf32>
    %474 = arith.mulf %469, %473 : vector<2x32xf32>
    %c0_104 = arith.constant 0 : index
    %c0_105 = arith.constant 0 : index
    %475 = vector.load %arg10[%c0_104, %c0_105] : memref<32x4xf32, #tpu.memory_space<vmem>>, vector<32x4xf32>
    %cst_106 = arith.constant dense<0.000000e+00> : vector<2x4xf32>
    %476 = tpu.matmul %474, %475, %cst_106 {dimension_numbers = #tpu.dot_dimension_numbers<[1], [0], [0], [1], [0, 0, 1, 1], [], []>} : vector<2x32xf32>, vector<32x4xf32>, vector<2x4xf32> -> vector<2x4xf32>
    %c0_107 = arith.constant 0 : index
    %c0_108 = arith.constant 0 : index
    %477 = vector.load %arg11[%c0_107, %c0_108] : memref<1x4xf32, #tpu.memory_space<vmem>>, vector<1x4xf32>
    %478 = vector.broadcast %477 : vector<1x4xf32> to vector<2x4xf32>
    %479 = arith.addf %476, %478 : vector<2x4xf32>
    %480 = math.tanh %479 : vector<2x4xf32>
    %cst_109 = arith.constant 1.000000e+00 : f32
    %481 = vector.broadcast %cst_109 : f32 to vector<2x4xf32>
    %482 = arith.mulf %481, %480 : vector<2x4xf32>
    %c0_110 = arith.constant 0 : index
    %c0_111 = arith.constant 0 : index
    %483 = vector.load %arg12[%c0_110, %c0_111] : memref<2x4xf32, #tpu.memory_space<vmem>>, vector<2x4xf32>
    tpu.vector_store %arg12[%c0_110, %c0_111], %482 {strides = array<i32>} : memref<2x4xf32, #tpu.memory_space<vmem>>, vector<2x4xf32>,
    return
  }
}

</mosaic_0001>

<bundles_post_ra>
// kernel: tpu_custom_call.1
= control target key start
LH: loop header
LB: loop body
LE: loop exit
PB: predicated region body
PF: predicated region fallthrough
CT: control target
= control target key end

     0   :  { %17 = vsyncpa [#allocation4], 0  ;;  %s4767_s0 = inlined_call_operand.hbm [shape: f32[16,16], index: 0, kind: input, shape index: {}]   ;;  %s4768_s1 = inlined_call_operand.hbm [shape: f32[16,128], index: 1, kind: input, shape index: {}]   ;;  %s4769_s2 = inlined_call_operand.vmem [shape: f32[32,128], index: 2, kind: input, shape index: {}]   ;;  %s4770_s3 = inlined_call_operand.vmem [shape: f32[1,128], index: 3, kind: input, shape index: {}]   ;;  %s4771_s4 = inlined_call_operand.hbm [shape: f32[32,128], index: 4, kind: input, shape index: {}]   ;;  %s4772_s5 = inlined_call_operand.hbm [shape: f32[32,128], index: 5, kind: input, shape index: {}]   ;;  %s4773_s6 = inlined_call_operand.vmem [shape: f32[1,128], index: 6, kind: input, shape index: {}]   ;;  %s4774_s7 = inlined_call_operand.hbm [shape: f32[32,128], index: 7, kind: input, shape index: {}]   ;;  %s4775_s8 = inlined_call_operand.vmem [shape: f32[32,128], index: 8, kind: input, shape index: {}]   ;;  %s4776_s9 = inlined_call_operand.hbm [shape: f32[1,128], index: 9, kind: input, shape index: {}]   ;;  %s4777_s10 = inlined_call_operand.vmem [shape: f32[32,4], index: 10, kind: input, shape index: {}]   ;;  %s4778_s11 = inlined_call_operand.vmem [shape: f32[1,4], index: 11, kind: input, shape index: {}]   ;;  %s4779_s12 = inlined_call_operand.hbm [shape: f32[2,4], index: 12, kind: output, shape index: {}]  }
   0x1   :  { %18 = vsyncpa [#allocation7], 0 }
   0x2   :  { %19 = vsyncpa [#allocation10], 0 }
   0x3   :  { %20 = vsyncpa [#allocation13], 0 }
   0x4   :  { %21 = vsyncpa [#allocation5], 0  ;;  %s4149_s21 = smov [#allocation6]   ;;  %s4150_s23 = smov [#allocation9]  }
   0x5   :  { %s39_s22 = sshll.u32 %s4149_s21, 4  ;;  %s67_s24 = sshll.u32 %s4150_s23, 4  ;;  %s40_s22 = int_to_ptr.vmem [resolvable:$true] %s39_s22  ;;  %s4228_s24 = int_to_ptr.vmem [resolvable:$true] %s67_s24 }
   0x6   :  { %s3985_s27 = scalar_lea.hbm %s4768_s1, 256 }
   0x7   :  { %p3986_p0 = scmp.ne.s32.totalorder %s4768_s1, %s3985_s27  ;;  %p3989_p1 = scmp.lt.u32.totalorder %s3985_s27, %s4768_s1 }
   0x9   :  { %p3991_p2 = pnand %p3989_p1, %p3986_p0 }
   0xb   :  { %3994 = shalt.err (!%p3991_p2)
}
   0xc   :  { %s3995_s14 = scalar_lea.vmem %s40_s22, 256  ;;  %p4000_p4 = scmp.lt.s32.totalorder %s40_s22, %s40_s22 }
   0xd   :  { %p3996_p3 = scmp.ne.s32.totalorder %s40_s22, %s3995_s14  ;;  %p4001_p5 = scmp.lt.s32.totalorder %s3995_s14, %s3995_s14 }
   0xf   :  { %p4002_p6 = por %p4001_p5, %p4000_p4 }
  0x11   :  { %p4003_p7 = pnand %p4002_p6, %p3996_p3 }
  0x13   :  { %4006 = shalt.err (!%p4003_p7)
}
  0x14   :  { %s4151_s15 = smov 128   ;;  %s4152_s16 = smov 8  }
  0x15   :  { %45 = dma.hbm_to_vmem [thread:$0]  %s4768_s1, 256, %s40_s22, [#allocation7], %s4151_s15, %s4151_s15, %s4152_s16  }
  0x16   :  { %s4007_s21 = scalar_lea.hbm %s4772_s5, 512 }
  0x17   :  { %p4008_p8 = scmp.ne.s32.totalorder %s4772_s5, %s4007_s21  ;;  %p4011_p9 = scmp.lt.u32.totalorder %s4007_s21, %s4772_s5 }
  0x19   :  { %p4013_p10 = pnand %p4011_p9, %p4008_p8 }
  0x1b   :  { %4016 = shalt.err (!%p4013_p10)
}
  0x1c   :  { %s4017_s28 = scalar_lea.vmem %s4228_s24, 512  ;;  %p4022_p12 = scmp.lt.s32.totalorder %s4228_s24, %s4228_s24 }
  0x1d   :  { %p4018_p11 = scmp.ne.s32.totalorder %s4228_s24, %s4017_s28  ;;  %p4023_p13 = scmp.lt.s32.totalorder %s4017_s28, %s4017_s28 }
  0x1f   :  { %p4024_p0 = por %p4023_p13, %p4022_p12 }
  0x21   :  { %p4025_p1 = pnand %p4024_p0, %p4018_p11 }
  0x23   :  { %4028 = shalt.err (!%p4025_p1)
}
  0x24   :  { %73 = dma.hbm_to_vmem [thread:$0]  %s4772_s5, 512, %s4228_s24, [#allocation10], %s4151_s15, %s4151_s15, %s4152_s16  }
  0x25   :  { %s4153_s29 = smov [#allocation3]   ;;  %s4154_s13 = smov [#allocation8]  }
  0x26   :  { %s27_s30 = sshll.u32 %s4153_s29, 4  ;;  %s55_s14 = sshll.u32 %s4154_s13, 4  ;;  %s28_s30 = int_to_ptr.vmem [resolvable:$true] %s27_s30  ;;  %s4265_s14 = int_to_ptr.vmem [resolvable:$true] %s55_s14 }
  0x27   :  { %s4029_s19 = scalar_lea.hbm %s4767_s0, 256 }
  0x28   :  { %p4030_p2 = scmp.ne.s32.totalorder %s4767_s0, %s4029_s19  ;;  %p4033_p3 = scmp.lt.u32.totalorder %s4029_s19, %s4767_s0 }
  0x2a   :  { %p4035_p4 = pnand %p4033_p3, %p4030_p2 }
  0x2c   :  { %4038 = shalt.err (!%p4035_p4)
}
  0x2d   :  { %s4039_s5 = scalar_lea.vmem %s28_s30, 256  ;;  %p4044_p6 = scmp.lt.s32.totalorder %s28_s30, %s28_s30 }
  0x2e   :  { %p4040_p5 = scmp.ne.s32.totalorder %s28_s30, %s4039_s5  ;;  %p4045_p7 = scmp.lt.s32.totalorder %s4039_s5, %s4039_s5 }
  0x30   :  { %p4046_p8 = por %p4045_p7, %p4044_p6 }
  0x32   :  { %p4047_p9 = pnand %p4046_p8, %p4040_p5 }
  0x34   :  { %4050 = shalt.err (!%p4047_p9)
}
  0x35   :  { %33 = dma.hbm_to_vmem [thread:$0]  %s4767_s0, 256, %s28_s30, [#allocation4], %s4151_s15, %s4151_s15, %s4152_s16  }
  0x36   :  { %s4051_s1 = scalar_lea.hbm %s4771_s4, 512 }
  0x37   :  { %p4052_p10 = scmp.ne.s32.totalorder %s4771_s4, %s4051_s1  ;;  %p4055_p11 = scmp.lt.u32.totalorder %s4051_s1, %s4771_s4 }
  0x39   :  { %p4057_p12 = pnand %p4055_p11, %p4052_p10 }
  0x3b   :  { %4060 = shalt.err (!%p4057_p12)
}
  0x3c   :  { %s4061_s18 = scalar_lea.vmem %s4265_s14, 512  ;;  %p4066_p0 = scmp.lt.s32.totalorder %s4265_s14, %s4265_s14 }
  0x3d   :  { %p4062_p13 = scmp.ne.s32.totalorder %s4265_s14, %s4061_s18  ;;  %p4067_p1 = scmp.lt.s32.totalorder %s4061_s18, %s4061_s18 }
  0x3f   :  { %p4068_p2 = por %p4067_p1, %p4066_p0 }
  0x41   :  { %p4069_p3 = pnand %p4068_p2, %p4062_p13 }
  0x43   :  { %4072 = shalt.err (!%p4069_p3)
}
  0x44   :  { %61 = dma.hbm_to_vmem [thread:$0]  %s4771_s4, 512, %s4265_s14, [#allocation7], %s4151_s15, %s4151_s15, %s4152_s16  }
  0x45   :  { %s4155_s19 = smov [#allocation11]   ;;  %s4156_s21 = smov [#allocation12]  }
  0x46   :  { %s81_s20 = sshll.u32 %s4155_s19, 4  ;;  %s96_s23 = sshll.u32 %s4156_s21, 4  ;;  %s82_s20 = int_to_ptr.vmem [resolvable:$true] %s81_s20  ;;  %s97_s23 = int_to_ptr.vmem [resolvable:$true] %s96_s23 }
  0x47   :  { %s4073_s24 = scalar_lea.hbm %s4774_s7, 512 }
  0x48   :  { %p4074_p4 = scmp.ne.s32.totalorder %s4774_s7, %s4073_s24  ;;  %p4077_p5 = scmp.lt.u32.totalorder %s4073_s24, %s4774_s7 }
  0x4a   :  { %p4079_p6 = pnand %p4077_p5, %p4074_p4 }
  0x4c   :  { %4082 = shalt.err (!%p4079_p6)
}
  0x4d   :  { %s4083_s4 = scalar_lea.vmem %s82_s20, 512  ;;  %p4088_p8 = scmp.lt.s32.totalorder %s82_s20, %s82_s20 }
  0x4e   :  { %p4084_p7 = scmp.ne.s32.totalorder %s82_s20, %s4083_s4  ;;  %p4089_p9 = scmp.lt.s32.totalorder %s4083_s4, %s4083_s4 }
  0x50   :  { %p4090_p10 = por %p4089_p9, %p4088_p8 }
  0x52   :  { %p4091_p11 = pnand %p4090_p10, %p4084_p7 }
  0x54   :  { %4094 = shalt.err (!%p4091_p11)
}
  0x55   :  { %87 = dma.hbm_to_vmem [thread:$0]  %s4774_s7, 512, %s82_s20, [#allocation10], %s4151_s15, %s4151_s15, %s4152_s16  }
  0x56   :  { %s4095_s17 = scalar_lea.hbm %s4776_s9, 16 }
  0x57   :  { %p4096_p12 = scmp.ne.s32.totalorder %s4776_s9, %s4095_s17  ;;  %p4099_p13 = scmp.lt.u32.totalorder %s4095_s17, %s4776_s9 }
  0x59   :  { %p4101_p0 = pnand %p4099_p13, %p4096_p12 }
  0x5b   :  { %4104 = shalt.err (!%p4101_p0)
}
  0x5c   :  { %s4105_s21 = scalar_lea.vmem %s97_s23, 16  ;;  %s4109_s25 = scalar_lea.vmem %s97_s23, 32 }
  0x5d   :  { %p4106_p1 = scmp.ne.s32.totalorder %s97_s23, %s4105_s21  ;;  %p4110_p2 = scmp.lt.s32.totalorder %s97_s23, %s97_s23 }
  0x5e   :  { %p4111_p3 = scmp.lt.s32.totalorder %s4109_s25, %s4105_s21 }
  0x60   :  { %p4112_p4 = por %p4111_p3, %p4110_p2 }
  0x62   :  { %p4113_p5 = pnand %p4112_p4, %p4106_p1 }
  0x64   :  { %4116 = shalt.err (!%p4113_p5)
}
  0x65   :  { %99 = dma.hbm_to_vmem [thread:$0]  %s4776_s9, 16, %s97_s23, [#allocation13]  }
  0x66   :  { %4139 = dma.done.wait [#allocation4], 256  }
  0x67   :  { %4140 = vsyncadd [#allocation4], 4294967040 }
  0x68   :  { %4141 = dma.done.wait [#allocation7], 768  }
  0x69   :  { %4142 = vsyncadd [#allocation7], 4294966528 }
  0x6a   :  { %4143 = dma.done.wait [#allocation10], 1024  }
  0x6b   :  { %4144 = vsyncadd [#allocation10], 4294966272 }
  0x6c   :  { %4145 = dma.done.wait [#allocation13], 16  }
  0x6d   :  { %4146 = vsyncadd [#allocation13], 4294967280  ;;  %v4157_v0 = vmov 0.0|0.0   ;;  %vm4158_vm0 = vmmov 0   ;;  %v4159_v1 = vmov 0.0   ;;  %vm137_vm1 = vcmask 130048  }
  0x6e   :  { %3611 = vmatprep.subr.bf16.mxu1 %v4157_v0  ;;  %3318 = vmatprep.mubr.msk.f32.mxu1 %vm4158_vm0, %v4159_v1  ;;  %v124_v2 = vld [vmem:[#allocation6] sm:$0xff]  ;;  %v125_v3 = vld [vmem:[#allocation6 + $0x8] sm:$0xff]  ;;  %v122_v7 = vld [vmem:[#allocation3] sm:$0xff]  ;;  %s4160_s1 = smov 64   ;;  %vm322_vm2 = vcmask 254976   ;;  %vm219_vm3 = vcmask 261120  }
  0x6f   :  { %v126_v4 = vld [vmem:[%s4769_s2] sm:$0xff]  ;;  %v3607_v5 = vpack.c.bf16 %v125_v3, %v124_v2  ;;  %v127_v6 = vld [vmem:[%s4769_s2 + $0x8] sm:$0xff]  ;;  %3307 = vmatprep.mubr.msk.f32.mxu0 %vm137_vm1, %v122_v7  ;;  %v128_v9 = vld [vmem:[%s4769_s2 + $0x10] sm:$0xff]  ;;  %vm431_vm4 = vcmask 257026   ;;  %vm655_vm5 = vcmask 261126   ;;  %vm543_vm6 = vcmask 259076  }
  0x70   :  { %v4338_v8 = vpack.c.bf16 %v127_v6, %v126_v4  ;;  %v129_v10 = vld [vmem:[%s4769_s2 + $0x18] sm:$0xff]  ;;  %v3106_v13 = vld [vmem:[%s4770_s3] ss:$0 sm:$0xff]  ;;  %s4161_s3 = smov 32   ;;  %vm3086_vm7 = vcmask 25600  }
  0x71   :  { %3608 = vmatprep.subr.bf16.mxu0 %v3607_v5  ;;  %v123_v11 = vld [vmem:[#allocation3 + $0x8] sm:$0xff]  ;;  %v4348_v12 = vpack.c.bf16 %v129_v10, %v128_v9 }
  0x72   :  { %3613 = vmatpush3.bf16.msra.mxu1 %v4338_v8  ;;  %3610 = vmatpush3.bf16.msra.mxu0 %v3607_v5 }
  0x73   :  { %3614 = vmatprep.subr.bf16.mxu1 %v4157_v0  ;;  %3617 = vmatprep.subr.bf16.mxu0 %v4157_v0 }
  0x75   :  { %3308 = vmatmul.mubr.msk.f32.vlgmr.msra.gmra.mrb[0].mxu0 %vm137_vm1, %v123_v11 }
  0x76   :  { %3616 = vmatpush3.bf16.msra.mxu1 %v4348_v12  ;;  %3619 = vmatpush3.bf16.msra.mxu0 %v4338_v8 }
  0x77   :  { %3620 = vmatprep.subr.bf16.mxu0 %v4157_v0  ;;  %3329 = vmatprep.mubr.msk.f32.mxu0 %vm4158_vm0, %v4159_v1 }
  0x78   :  { %3623 = vmatprep.subr.bf16.mxu1 %v4157_v0 }
  0x79   :  { %3319 = vmatmul.mubr.f32.vlgmr.msra.gmra.mrb[0].mxu1 %v4159_v1 }
  0x7a   :  { %3622 = vmatpush3.bf16.msra.mxu0 %v4348_v12  ;;  %3625 = vmatpush3.bf16.msra.mxu1 %v4338_v8 }
  0x7b   :  { %3626 = vmatprep.subr.bf16.mxu1 %v4157_v0  ;;  %3340 = vmatprep.mubr.msk.f32.mxu1 %vm4158_vm0, %v4159_v1 }
  0x7c   :  { %3629 = vmatprep.subr.bf16.mxu0 %v4157_v0 }
  0x7e   :  { %3628 = vmatpush3.bf16.msra.mxu1 %v4348_v12 }
  0x7f   :  { %3635 = vmatprep.subr.bf16.mxu1 %v4157_v0 }
 0x148   :  { %v3309_v14 = vpop.f32.mrb[0].mxu0 }
 0x149   :  { %v4371_v15 = vadd.f32 %v3309_v14, %v3106_v13  ;;  %v210_v16 = vpop.f32.mrb[1].mxu0 }
 0x14a   :  { %v4373_v17 = vadd.f32 %v3106_v13, %v210_v16 }
 0x14c   :  { %v289_v18 = vpop.f32.mrb[0].mxu1 }
 0x14d   :  { %v293_v19 = vadd.f32 %v289_v18, %v4373_v17  ;;  %v3320_v20 = vpop.f32.mrb[1].mxu1 }
 0x14f   :  { %3791 = vtanh.f32 %v293_v19  ;;  %v3109_v22 = vmul.f32 -1.442695, %v293_v19 }
 0x151   :  { %3793 = vpow2.f32 %v3109_v22 }
 0x159   :  { %v3792_v21 = vpop.eup %3791 }
 0x15a   :  { %303 = vrot.lane.b32.xlu0 %v3792_v21, %s4160_s1 }
 0x15b   :  { %v3794_v23 = vpop.eup %3793 }
 0x15c   :  { %v297_v24 = vadd.f32 1.0, %v3794_v23 }
 0x15e   :  { %3795 = vrcp.f32 %v297_v24 }
 0x168   :  { %v3796_v25 = vpop.eup %3795 }
 0x169   :  { %v301_v28 = vmul.f32 0.0, %v3796_v25 }
 0x1cc   :  { %v304_v26 = vpop.permute.xlu0 %303 }
 0x1cd   :  { %v306_v27 = vmul.f32 %v3796_v25, %v304_v26 }
 0x1cf   :  { %308 = vrot.lane.b32.xlu0 %v306_v27, %s4161_s3 }
 0x241   :  { %v309_v29 = vpop.permute.xlu0 %308 }
 0x242   :  { %v311_v30 = vadd.f32 %v309_v29, %v301_v28 }
 0x244   :  { %3797 = vtanh.f32 %v311_v30  ;;  %v408_v46 = vrot.slane %v311_v30, 6 }
 0x24e   :  { %v3798_v31 = vpop.eup %3797 }
 0x24f   :  { %314 = vrot.lane.b32.xlu1 %v3798_v31, %s4160_s1 }
 0x2c1   :  { %v315_v32 = vpop.permute.xlu1 %314 }
 0x2c2   :  { %v317_v33 = vmul.f32 %v3796_v25, %v315_v32 }
 0x2c4   :  { %319 = vrot.lane.b32.xlu1 %v317_v33, %s4161_s3 }
 0x336   :  { %v320_v34 = vpop.permute.xlu1 %319 }
 0x337   :  { %323 = vst.msk [vmem:[#allocation2] sm:$0x3] %vm322_vm2, %v320_v34  ;;  %3330 = vmatmul.mubr.msk.f32.vlgmr.msra.gmra.mrb[2].mxu0 %vm219_vm3, %v320_v34 }
 0x338   :  { %3631 = vmatpush3.bf16.msra.mxu0 %v4338_v8  ;;  %3351 = vmatprep.mubr.msk.f32.mxu0 %vm4158_vm0, %v4159_v1 }
 0x339   :  { %3632 = vmatprep.subr.bf16.mxu0 %v4157_v0 }
 0x33c   :  { %3634 = vmatpush3.bf16.msra.mxu0 %v4348_v12 }
 0x33d   :  { %3641 = vmatprep.subr.bf16.mxu0 %v4157_v0 }
 0x40a   :  { %v392_v35 = vpop.f32.mrb[2].mxu0 }
 0x40b   :  { %v397_v36 = vrot.slane %v392_v35, 6  ;;  %v3331_v37 = vpop.f32.mrb[3].mxu0 }
 0x40d   :  { %v399_v38 = vadd.f32 %v397_v36, %v4373_v17 }
 0x40f   :  { %3799 = vtanh.f32 %v399_v38  ;;  %v3111_v40 = vmul.f32 -1.442695, %v399_v38 }
 0x411   :  { %3801 = vpow2.f32 %v3111_v40 }
 0x419   :  { %v3800_v39 = vpop.eup %3799 }
 0x41a   :  { %412 = vrot.lane.b32.xlu0 %v3800_v39, %s4160_s1 }
 0x41b   :  { %v3802_v41 = vpop.eup %3801 }
 0x41c   :  { %v403_v42 = vadd.f32 1.0, %v3802_v41 }
 0x41e   :  { %3803 = vrcp.f32 %v403_v42 }
 0x428   :  { %v3804_v43 = vpop.eup %3803 }
 0x429   :  { %v410_v47 = vmul.f32 %v3804_v43, %v408_v46 }
 0x48c   :  { %v413_v44 = vpop.permute.xlu0 %412 }
 0x48d   :  { %v415_v45 = vmul.f32 %v3804_v43, %v413_v44 }
 0x48f   :  { %417 = vrot.lane.b32.xlu1 %v415_v45, %s4161_s3 }
 0x501   :  { %v418_v48 = vpop.permute.xlu1 %417 }
 0x502   :  { %v420_v49 = vadd.f32 %v418_v48, %v410_v47 }
 0x504   :  { %3805 = vtanh.f32 %v420_v49  ;;  %v520_v4 = vrot.slane %v420_v49, 6 }
 0x50e   :  { %v3806_v50 = vpop.eup %3805 }
 0x50f   :  { %423 = vrot.lane.b32.xlu0 %v3806_v50, %s4160_s1 }
 0x581   :  { %v424_v51 = vpop.permute.xlu0 %423 }
 0x582   :  { %v4392_v52 = vmul.f32 %v3804_v43, %v424_v51 }
 0x584   :  { %v433_v53 = vrot.slane %v4392_v52, 2 }
 0x586   :  { %434 = vrot.lane.b32.xlu1 %v433_v53, %s4161_s3 }
 0x5f8   :  { %v435_v54 = vpop.permute.xlu1 %434 }
 0x5f9   :  { %3341 = vmatmul.mubr.msk.f32.vlgmr.msra.gmra.mrb[2].mxu1 %vm219_vm3, %v435_v54 }
 0x5fa   :  { %3637 = vmatpush3.bf16.msra.mxu1 %v4338_v8  ;;  %3362 = vmatprep.mubr.msk.f32.mxu1 %vm4158_vm0, %v4159_v1 }
 0x5fb   :  { %3638 = vmatprep.subr.bf16.mxu1 %v4157_v0 }
 0x5fe   :  { %3640 = vmatpush3.bf16.msra.mxu1 %v4348_v12 }
 0x5ff   :  { %3647 = vmatprep.subr.bf16.mxu1 %v4157_v0 }
 0x6cc   :  { %v504_v55 = vpop.f32.mrb[2].mxu1 }
 0x6cd   :  { %v509_v56 = vrot.slane %v504_v55, 4  ;;  %v3342_v57 = vpop.f32.mrb[3].mxu1 }
 0x6cf   :  { %v511_v58 = vadd.f32 %v509_v56, %v4373_v17 }
 0x6d1   :  { %3807 = vtanh.f32 %v511_v58  ;;  %v3113_v60 = vmul.f32 -1.442695, %v511_v58 }
 0x6d3   :  { %3809 = vpow2.f32 %v3113_v60 }
 0x6db   :  { %v3808_v59 = vpop.eup %3807 }
 0x6dc   :  { %524 = vrot.lane.b32.xlu0 %v3808_v59, %s4160_s1 }
 0x6dd   :  { %v3810_v61 = vpop.eup %3809 }
 0x6de   :  { %v515_v62 = vadd.f32 1.0, %v3810_v61 }
 0x6e0   :  { %3811 = vrcp.f32 %v515_v62 }
 0x6ea   :  { %v3812_v63 = vpop.eup %3811 }
 0x6eb   :  { %v522_v5 = vmul.f32 %v3812_v63, %v520_v4 }
 0x74e   :  { %v525_v2 = vpop.permute.xlu0 %524 }
 0x74f   :  { %v527_v3 = vmul.f32 %v3812_v63, %v525_v2 }
 0x751   :  { %529 = vrot.lane.b32.xlu1 %v527_v3, %s4161_s3 }
 0x7c3   :  { %v530_v6 = vpop.permute.xlu1 %529 }
 0x7c4   :  { %v532_v7 = vadd.f32 %v530_v6, %v522_v5 }
 0x7c6   :  { %3813 = vtanh.f32 %v532_v7  ;;  %v632_v28 = vrot.slane %v532_v7, 6 }
 0x7d0   :  { %v3814_v9 = vpop.eup %3813 }
 0x7d1   :  { %535 = vrot.lane.b32.xlu0 %v3814_v9, %s4160_s1 }
 0x843   :  { %v536_v10 = vpop.permute.xlu0 %535 }
 0x844   :  { %v4407_v11 = vmul.f32 %v3812_v63, %v536_v10 }
 0x846   :  { %v545_v13 = vrot.slane %v4407_v11, 4 }
 0x848   :  { %546 = vrot.lane.b32.xlu1 %v545_v13, %s4161_s3 }
 0x8ba   :  { %v547_v14 = vpop.permute.xlu1 %546 }
 0x8bb   :  { %3352 = vmatmul.mubr.msk.f32.vlgmr.msra.gmra.mrb[4].mxu0 %vm219_vm3, %v547_v14 }
 0x8bc   :  { %3643 = vmatpush3.bf16.msra.mxu0 %v4338_v8  ;;  %3373 = vmatprep.mubr.msk.f32.mxu0 %vm4158_vm0, %v4159_v1 }
 0x8bd   :  { %3644 = vmatprep.subr.bf16.mxu0 %v4157_v0 }
 0x8c0   :  { %3646 = vmatpush3.bf16.msra.mxu0 %v4348_v12 }
 0x8c1   :  { %3653 = vmatprep.subr.bf16.mxu0 %v4157_v0 }
 0x98e   :  { %v616_v16 = vpop.f32.mrb[4].mxu0 }
 0x98f   :  { %v621_v18 = vrot.slane %v616_v16, 2  ;;  %v3353_v19 = vpop.f32.mrb[5].mxu0 }
 0x991   :  { %v623_v20 = vadd.f32 %v621_v18, %v4373_v17 }
 0x993   :  { %3815 = vtanh.f32 %v623_v20  ;;  %v3115_v22 = vmul.f32 -1.442695, %v623_v20 }
 0x995   :  { %3817 = vpow2.f32 %v3115_v22 }
 0x99d   :  { %v3816_v21 = vpop.eup %3815 }
 0x99e   :  { %636 = vrot.lane.b32.xlu0 %v3816_v21, %s4160_s1 }
 0x99f   :  { %v3818_v23 = vpop.eup %3817 }
 0x9a0   :  { %v627_v24 = vadd.f32 1.0, %v3818_v23 }
 0x9a2   :  { %3819 = vrcp.f32 %v627_v24 }
 0x9ac   :  { %v3820_v25 = vpop.eup %3819 }
 0x9ad   :  { %v634_v29 = vmul.f32 %v3820_v25, %v632_v28 }
 0xa10   :  { %v637_v26 = vpop.permute.xlu0 %636 }
 0xa11   :  { %v639_v27 = vmul.f32 %v3820_v25, %v637_v26 }
 0xa13   :  { %641 = vrot.lane.b32.xlu1 %v639_v27, %s4161_s3 }
 0xa85   :  { %v642_v30 = vpop.permute.xlu1 %641 }
 0xa86   :  { %v644_v31 = vadd.f32 %v642_v30, %v634_v29 }
 0xa88   :  { %3821 = vtanh.f32 %v644_v31  ;;  %v741_v46 = vrot.slane %v644_v31, 6 }
 0xa92   :  { %v3822_v17 = vpop.eup %3821 }
 0xa93   :  { %647 = vrot.lane.b32.xlu0 %v3822_v17, %s4160_s1 }
 0xb05   :  { %v648_v32 = vpop.permute.xlu0 %647 }
 0xb06   :  { %v4422_v33 = vmul.f32 %v3820_v25, %v648_v32 }
 0xb08   :  { %v657_v34 = vrot.slane %v4422_v33, 6 }
 0xb0a   :  { %658 = vrot.lane.b32.xlu1 %v657_v34, %s4161_s3 }
 0xb7c   :  { %v659_v35 = vpop.permute.xlu1 %658 }
 0xb7d   :  { %3363 = vmatmul.mubr.msk.f32.vlgmr.msra.gmra.mrb[4].mxu1 %vm219_vm3, %v659_v35 }
 0xb7e   :  { %3649 = vmatpush3.bf16.msra.mxu1 %v4338_v8  ;;  %3384 = vmatprep.mubr.msk.f32.mxu1 %vm4158_vm0, %v4159_v1 }
 0xb7f   :  { %3650 = vmatprep.subr.bf16.mxu1 %v4157_v0 }
 0xb82   :  { %3652 = vmatpush3.bf16.msra.mxu1 %v4348_v12 }
 0xc50   :  { %v728_v36 = vpop.f32.mrb[4].mxu1 }
 0xc51   :  { %v732_v37 = vadd.f32 %v728_v36, %v4371_v15  ;;  %v3364_v38 = vpop.f32.mrb[5].mxu1 }
 0xc53   :  { %3823 = vtanh.f32 %v732_v37  ;;  %v3117_v40 = vmul.f32 -1.442695, %v732_v37 }
 0xc55   :  { %3825 = vpow2.f32 %v3117_v40 }
 0xc5d   :  { %v3824_v39 = vpop.eup %3823 }
 0xc5e   :  { %745 = vrot.lane.b32.xlu0 %v3824_v39, %s4160_s1 }
 0xc5f   :  { %v3826_v41 = vpop.eup %3825 }
 0xc60   :  { %v736_v42 = vadd.f32 1.0, %v3826_v41 }
 0xc62   :  { %3827 = vrcp.f32 %v736_v42 }
 0xc6c   :  { %v3828_v43 = vpop.eup %3827 }
 0xc6d   :  { %v743_v47 = vmul.f32 %v3828_v43, %v741_v46 }
 0xcd0   :  { %v746_v44 = vpop.permute.xlu0 %745 }
 0xcd1   :  { %v748_v45 = vmul.f32 %v3828_v43, %v746_v44 }
 0xcd3   :  { %750 = vrot.lane.b32.xlu1 %v748_v45, %s4161_s3 }
 0xd45   :  { %v751_v48 = vpop.permute.xlu1 %750 }
 0xd46   :  { %v753_v49 = vadd.f32 %v751_v48, %v743_v47 }
 0xd48   :  { %3829 = vtanh.f32 %v753_v49 }
 0xd52   :  { %v3830_v50 = vpop.eup %3829 }
 0xd53   :  { %756 = vrot.lane.b32.xlu0 %v3830_v50, %s4160_s1 }
 0xdc5   :  { %v757_v51 = vpop.permute.xlu0 %756 }
 0xdc6   :  { %v759_v53 = vmul.f32 %v3828_v43, %v757_v51 }
 0xdc8   :  { %761 = vrot.lane.b32.xlu1 %v759_v53, %s4161_s3 }
 0xe3a   :  { %v762_v54 = vpop.permute.xlu1 %761 }
 0xe3b   :  { %764 = vst.msk [vmem:[#allocation2 + $0x8] sm:$0x3] %vm322_vm2, %v762_v54  ;;  %3374 = vmatmul.mubr.msk.f32.vlgmr.msra.gmra.mrb[6].mxu0 %vm219_vm3, %v762_v54  ;;  %v1098_v54 = vld [vmem:[#allocation8 + $0x8] sm:$0xff] }
 0xe3c   :  { %3655 = vmatpush3.bf16.msra.mxu0 %v4338_v8  ;;  %3395 = vmatprep.mubr.msk.f32.mxu0 %vm4158_vm0, %v4159_v1 }
 0xe3d   :  { %3656 = vmatprep.subr.bf16.mxu0 %v4157_v0 }
 0xe40   :  { %3658 = vmatpush3.bf16.msra.mxu0 %v4348_v12  ;;  %v849_v12 = vrot.slane %v753_v49, 6 }
 0xe41   :  { %3667 = vmatprep.subr.bf16.mxu0 %v4157_v0 }
 0xf0e   :  { %v833_v55 = vpop.f32.mrb[6].mxu0 }
 0xf0f   :  { %v838_v56 = vrot.slane %v833_v55, 6  ;;  %v3375_v57 = vpop.f32.mrb[7].mxu0 }
 0xf10   :  { %v1102_v57 = vld [vmem:[#allocation9 + $0x8] sm:$0xff] }
 0xf11   :  { %v840_v58 = vadd.f32 %v838_v56, %v4371_v15  ;;  %v1101_v56 = vld [vmem:[#allocation9] sm:$0xff] }
 0xf13   :  { %3831 = vtanh.f32 %v840_v58  ;;  %v3119_v60 = vmul.f32 -1.442695, %v840_v58  ;;  %v1099_v58 = vld [vmem:[#allocation8 + $0x10] sm:$0xff] }
 0xf15   :  { %3833 = vpow2.f32 %v3119_v60  ;;  %v1100_v60 = vld [vmem:[#allocation8 + $0x18] sm:$0xff] }
 0xf1d   :  { %v3832_v59 = vpop.eup %3831 }
 0xf1e   :  { %853 = vrot.lane.b32.xlu0 %v3832_v59, %s4160_s1  ;;  %v4478_v59 = vpack.c.bf16 %v1102_v57, %v1101_v56 }
 0xf1f   :  { %v3834_v8 = vpop.eup %3833 }
 0xf20   :  { %v844_v61 = vadd.f32 1.0, %v3834_v8  ;;  %v1103_v8 = vld [vmem:[#allocation9 + $0x10] sm:$0xff] }
 0xf22   :  { %3835 = vrcp.f32 %v844_v61  ;;  %v1104_v61 = vld [vmem:[#allocation9 + $0x18] sm:$0xff] }
 0xf2c   :  { %v3836_v62 = vpop.eup %3835 }
 0xf2d   :  { %v851_v3 = vmul.f32 %v3836_v62, %v849_v12 }
 0xf90   :  { %v854_v63 = vpop.permute.xlu0 %853 }
 0xf91   :  { %v856_v2 = vmul.f32 %v3836_v62, %v854_v63 }
 0xf93   :  { %858 = vrot.lane.b32.xlu1 %v856_v2, %s4161_s3 }
0x1005   :  { %v859_v4 = vpop.permute.xlu1 %858 }
0x1006   :  { %v861_v5 = vadd.f32 %v859_v4, %v851_v3 }
0x1008   :  { %3837 = vtanh.f32 %v861_v5  ;;  %v960_v27 = vrot.slane %v861_v5, 6 }
0x1012   :  { %v3838_v6 = vpop.eup %3837 }
0x1013   :  { %864 = vrot.lane.b32.xlu0 %v3838_v6, %s4160_s1 }
0x1085   :  { %v865_v7 = vpop.permute.xlu0 %864 }
0x1086   :  { %v4449_v9 = vmul.f32 %v3836_v62, %v865_v7  ;;  %v3663_v62 = vpack.c.bf16 %v1100_v60, %v1099_v58 }
0x1088   :  { %v873_v10 = vrot.slane %v4449_v9, 2 }
0x108a   :  { %874 = vrot.lane.b32.xlu1 %v873_v10, %s4161_s3  ;;  %v3124_v10 = vld [vmem:[%s4773_s6] ss:$0 sm:$0xff] }
0x10fc   :  { %v875_v13 = vpop.permute.xlu1 %874 }
0x10fd   :  { %3385 = vmatmul.mubr.msk.f32.vlgmr.msra.gmra.mrb[6].mxu1 %vm219_vm3, %v875_v13 }
0x11d0   :  { %v944_v14 = vpop.f32.mrb[6].mxu1 }
0x11d1   :  { %v949_v16 = vrot.slane %v944_v14, 4  ;;  %v3386_v18 = vpop.f32.mrb[7].mxu1 }
0x11d3   :  { %v951_v19 = vadd.f32 %v949_v16, %v4371_v15 }
0x11d5   :  { %3839 = vtanh.f32 %v951_v19  ;;  %v3121_v21 = vmul.f32 -1.442695, %v951_v19 }
0x11d7   :  { %3841 = vpow2.f32 %v3121_v21 }
0x11df   :  { %v3840_v20 = vpop.eup %3839 }
0x11e0   :  { %964 = vrot.lane.b32.xlu0 %v3840_v20, %s4160_s1 }
0x11e1   :  { %v3842_v22 = vpop.eup %3841 }
0x11e2   :  { %v955_v23 = vadd.f32 1.0, %v3842_v22 }
0x11e4   :  { %3843 = vrcp.f32 %v955_v23 }
0x11ee   :  { %v3844_v24 = vpop.eup %3843 }
0x11ef   :  { %v962_v28 = vmul.f32 %v3844_v24, %v960_v27 }
0x1252   :  { %v965_v25 = vpop.permute.xlu0 %964 }
0x1253   :  { %v967_v26 = vmul.f32 %v3844_v24, %v965_v25 }
0x1255   :  { %969 = vrot.lane.b32.xlu1 %v967_v26, %s4161_s3 }
0x12c7   :  { %v970_v29 = vpop.permute.xlu1 %969 }
0x12c8   :  { %v972_v30 = vadd.f32 %v970_v29, %v962_v28 }
0x12ca   :  { %3845 = vtanh.f32 %v972_v30 }
0x12d4   :  { %v3846_v31 = vpop.eup %3845 }
0x12d5   :  { %975 = vrot.lane.b32.xlu0 %v3846_v31, %s4160_s1 }
0x1347   :  { %v976_v17 = vpop.permute.xlu0 %975 }
0x1348   :  { %v978_v32 = vmul.f32 %v3844_v24, %v976_v17 }
0x134a   :  { %v984_v34 = vrot.slane %v978_v32, 4 }
0x134c   :  { %985 = vrot.lane.b32.xlu1 %v984_v34, %s4161_s3 }
0x13be   :  { %v986_v35 = vpop.permute.xlu1 %985 }
0x13bf   :  { %3396 = vmatmul.mubr.msk.f32.vlgmr.msra.gmra.mrb[8].mxu0 %vm219_vm3, %v986_v35 }
0x13c0   :  { %3417 = vmatprep.mubr.msk.f32.mxu0 %vm4158_vm0, %v4159_v1  ;;  %3669 = vmatpush3.bf16.msra.mxu0 %v4478_v59 }
0x13c1   :  { %3670 = vmatprep.subr.bf16.mxu0 %v4157_v0 }
0x1492   :  { %v1055_v36 = vpop.f32.mrb[8].mxu0 }
0x1493   :  { %v1060_v37 = vrot.slane %v1055_v36, 2  ;;  %v3397_v38 = vpop.f32.mrb[9].mxu0 }
0x1495   :  { %v1062_v39 = vadd.f32 %v1060_v37, %v4371_v15  ;;  %v1071_v15 = vrot.slane %v972_v30, 6 }
0x1497   :  { %3847 = vtanh.f32 %v1062_v39  ;;  %v3123_v41 = vmul.f32 -1.442695, %v1062_v39 }
0x1499   :  { %3849 = vpow2.f32 %v3123_v41 }
0x14a1   :  { %v3848_v40 = vpop.eup %3847 }
0x14a2   :  { %1075 = vrot.lane.b32.xlu0 %v3848_v40, %s4160_s1 }
0x14a3   :  { %v3850_v42 = vpop.eup %3849 }
0x14a4   :  { %v1066_v43 = vadd.f32 1.0, %v3850_v42 }
0x14a6   :  { %3851 = vrcp.f32 %v1066_v43 }
0x14b0   :  { %v3852_v44 = vpop.eup %3851 }
0x14b1   :  { %v1073_v47 = vmul.f32 %v3852_v44, %v1071_v15 }
0x1514   :  { %v1076_v45 = vpop.permute.xlu0 %1075 }
0x1515   :  { %v1078_v46 = vmul.f32 %v3852_v44, %v1076_v45 }
0x1517   :  { %1080 = vrot.lane.b32.xlu1 %v1078_v46, %s4161_s3 }
0x151b   :  { %428 = vrot.lane.b32.xlu1 %v4392_v52, %s4161_s3 }
0x151f   :  { %652 = vrot.lane.b32.xlu1 %v4422_v33, %s4161_s3  ;;  %v1097_v33 = vld [vmem:[#allocation8] sm:$0xff] }
0x1520   :  { %v3659_v55 = vpack.c.bf16 %v1098_v54, %v1097_v33 }
0x1522   :  { %3660 = vmatprep.subr.bf16.mxu1 %v3659_v55 }
0x1523   :  { %980 = vrot.lane.b32.xlu1 %v978_v32, %s4161_s3  ;;  %3662 = vmatpush3.bf16.msra.mxu1 %v3659_v55 }
0x1524   :  { %3664 = vmatprep.subr.bf16.mxu1 %v3663_v62 }
0x1527   :  { %3666 = vmatpush3.bf16.msra.mxu1 %v3663_v62 }
0x1528   :  { %3673 = vmatprep.subr.bf16.mxu1 %v4157_v0 }
0x1589   :  { %v1081_v48 = vpop.permute.xlu1 %1080 }
0x158a   :  { %v1083_v49 = vadd.f32 %v1081_v48, %v1073_v47 }
0x158c   :  { %3853 = vtanh.f32 %v1083_v49 }
0x158d   :  { %v429_v50 = vpop.permute.xlu1 %428 }
0x158e   :  { %432 = vst.msk [vmem:[#allocation2] sm:$0xc] %vm431_vm4, %v429_v50 }
0x1591   :  { %v653_v51 = vpop.permute.xlu1 %652 }
0x1592   :  { %656 = vst.msk [vmem:[#allocation2] sm:$0xc0] %vm655_vm5, %v653_v51 }
0x1595   :  { %v981_v52 = vpop.permute.xlu1 %980 }
0x1596   :  { %v3854_v53 = vpop.eup %3853  ;;  %983 = vst.msk [vmem:[#allocation2 + $0x8] sm:$0x30] %vm543_vm6, %v981_v52 }
0x1597   :  { %1086 = vrot.lane.b32.xlu0 %v3854_v53, %s4160_s1 }
0x159b   :  { %540 = vrot.lane.b32.xlu0 %v4407_v11, %s4161_s3  ;;  %v4481_v11 = vpack.c.bf16 %v1104_v61, %v1103_v8 }
0x159d   :  { %3672 = vmatpush3.bf16.msra.mxu0 %v4481_v11 }
0x159e   :  { %3679 = vmatprep.subr.bf16.mxu0 %v4157_v0 }
0x159f   :  { %869 = vrot.lane.b32.xlu0 %v4449_v9, %s4161_s3 }
0x15a0   :  { %3418 = vmatmul.mubr.f32.vlgmr.msra.gmra.mrb[10].mxu0 %v4159_v1 }
0x15a1   :  { %3681 = vmatpush3.bf16.msra.mxu0 %v4478_v59  ;;  %3439 = vmatprep.mubr.msk.f32.mxu0 %vm4158_vm0, %v4159_v1 }
0x15a2   :  { %3682 = vmatprep.subr.bf16.mxu0 %v4157_v0 }
0x15a5   :  { %3684 = vmatpush3.bf16.msra.mxu0 %v4481_v11 }
0x15a6   :  { %3691 = vmatprep.subr.bf16.mxu0 %v4157_v0 }
0x1609   :  { %v1087_v63 = vpop.permute.xlu0 %1086 }
0x160a   :  { %v1089_v2 = vmul.f32 %v3852_v44, %v1087_v63 }
0x160c   :  { %1091 = vrot.lane.b32.xlu0 %v1089_v2, %s4161_s3 }
0x160d   :  { %v541_v12 = vpop.permute.xlu0 %540 }
0x160e   :  { %544 = vst.msk [vmem:[#allocation2] sm:$0x30] %vm543_vm6, %v541_v12 }
0x1611   :  { %v870_v3 = vpop.permute.xlu0 %869 }
0x1612   :  { %872 = vst.msk [vmem:[#allocation2 + $0x8] sm:$0xc] %vm431_vm4, %v870_v3 }
0x1615   :  { %v1095_v4 = vld [vmem:[#allocation2] sm:$0xff] }
0x1616   :  { %3406 = vmatprep.mubr.msk.f32.mxu1 %vm219_vm3, %v1095_v4 }
0x1673   :  { %v1259_v7 = vpop.f32.mrb[10].mxu0 }
0x1674   :  { %v3419_v9 = vpop.f32.mrb[11].mxu0 }
0x167e   :  { %v1092_v5 = vpop.permute.xlu0 %1091 }
0x167f   :  { %1094 = vst.msk [vmem:[#allocation2 + $0x8] sm:$0xc0] %vm655_vm5, %v1092_v5 }
0x1686   :  { %v1096_v6 = vld [vmem:[#allocation2 + $0x8] sm:$0xff] }
0x1687   :  { %3407 = vmatmul.mubr.msk.f32.vlgmr.msra.gmra.mrb[8].mxu1 %vm219_vm3, %v1096_v6 }
0x1688   :  { %3675 = vmatpush3.bf16.msra.mxu1 %v4478_v59  ;;  %3428 = vmatprep.mubr.msk.f32.mxu1 %vm4158_vm0, %v4159_v1 }
0x1689   :  { %3676 = vmatprep.subr.bf16.mxu1 %v4157_v0 }
0x168c   :  { %3678 = vmatpush3.bf16.msra.mxu1 %v4481_v11 }
0x168d   :  { %3685 = vmatprep.subr.bf16.mxu1 %v4157_v0 }
0x175a   :  { %v3408_v13 = vpop.f32.mrb[8].mxu1 }
0x175b   :  { %v4509_v14 = vadd.f32 %v3408_v13, %v3124_v10  ;;  %v1184_v16 = vpop.f32.mrb[9].mxu1 }
0x175c   :  { %v4511_v18 = vadd.f32 %v3124_v10, %v1184_v16 }
0x175e   :  { %v1263_v19 = vadd.f32 %v1259_v7, %v4511_v18 }
0x1760   :  { %3855 = vtanh.f32 %v1263_v19  ;;  %v3127_v21 = vmul.f32 -1.442695, %v1263_v19 }
0x1762   :  { %3857 = vpow2.f32 %v3127_v21 }
0x176a   :  { %v3856_v20 = vpop.eup %3855 }
0x176b   :  { %1273 = vrot.lane.b32.xlu1 %v3856_v20, %s4160_s1 }
0x176c   :  { %v3858_v22 = vpop.eup %3857 }
0x176d   :  { %v1267_v23 = vadd.f32 1.0, %v3858_v22 }
0x176f   :  { %3859 = vrcp.f32 %v1267_v23 }
0x1779   :  { %v3860_v24 = vpop.eup %3859 }
0x177a   :  { %v1271_v27 = vmul.f32 0.0, %v3860_v24 }
0x17dd   :  { %v1274_v25 = vpop.permute.xlu1 %1273 }
0x17de   :  { %v1276_v26 = vmul.f32 %v3860_v24, %v1274_v25 }
0x17e0   :  { %1278 = vrot.lane.b32.xlu0 %v1276_v26, %s4161_s3 }
0x1852   :  { %v1279_v28 = vpop.permute.xlu0 %1278 }
0x1853   :  { %v1281_v29 = vadd.f32 %v1279_v28, %v1271_v27 }
0x1855   :  { %3861 = vtanh.f32 %v1281_v29  ;;  %v1377_v45 = vrot.slane %v1281_v29, 6 }
0x185f   :  { %v3862_v30 = vpop.eup %3861 }
0x1860   :  { %1284 = vrot.lane.b32.xlu1 %v3862_v30, %s4160_s1 }
0x18d2   :  { %v1285_v31 = vpop.permute.xlu1 %1284 }
0x18d3   :  { %v1287_v17 = vmul.f32 %v3860_v24, %v1285_v31 }
0x18d5   :  { %1289 = vrot.lane.b32.xlu0 %v1287_v17, %s4161_s3 }
0x1947   :  { %v1290_v32 = vpop.permute.xlu0 %1289 }
0x1948   :  { %1292 = vst.msk [vmem:[#allocation2] sm:$0x3] %vm322_vm2, %v1290_v32  ;;  %3429 = vmatmul.mubr.msk.f32.vlgmr.msra.gmra.mrb[10].mxu1 %vm219_vm3, %v1290_v32 }
0x1949   :  { %3687 = vmatpush3.bf16.msra.mxu1 %v4478_v59  ;;  %3450 = vmatprep.mubr.msk.f32.mxu1 %vm4158_vm0, %v4159_v1 }
0x194a   :  { %3688 = vmatprep.subr.bf16.mxu1 %v4157_v0 }
0x194d   :  { %3690 = vmatpush3.bf16.msra.mxu1 %v4481_v11 }
0x194e   :  { %3697 = vmatprep.subr.bf16.mxu1 %v4157_v0 }
0x1a1b   :  { %v1361_v34 = vpop.f32.mrb[10].mxu1 }
0x1a1c   :  { %v1366_v35 = vrot.slane %v1361_v34, 6  ;;  %v3430_v36 = vpop.f32.mrb[11].mxu1 }
0x1a1e   :  { %v1368_v37 = vadd.f32 %v1366_v35, %v4511_v18 }
0x1a20   :  { %3863 = vtanh.f32 %v1368_v37  ;;  %v3129_v39 = vmul.f32 -1.442695, %v1368_v37 }
0x1a22   :  { %3865 = vpow2.f32 %v3129_v39 }
0x1a2a   :  { %v3864_v38 = vpop.eup %3863 }
0x1a2b   :  { %1381 = vrot.lane.b32.xlu1 %v3864_v38, %s4160_s1 }
0x1a2c   :  { %v3866_v40 = vpop.eup %3865 }
0x1a2d   :  { %v1372_v41 = vadd.f32 1.0, %v3866_v40 }
0x1a2f   :  { %3867 = vrcp.f32 %v1372_v41 }
0x1a39   :  { %v3868_v42 = vpop.eup %3867 }
0x1a3a   :  { %v1379_v46 = vmul.f32 %v3868_v42, %v1377_v45 }
0x1a9d   :  { %v1382_v43 = vpop.permute.xlu1 %1381 }
0x1a9e   :  { %v1384_v44 = vmul.f32 %v3868_v42, %v1382_v43 }
0x1aa0   :  { %1386 = vrot.lane.b32.xlu0 %v1384_v44, %s4161_s3 }
0x1b12   :  { %v1387_v15 = vpop.permute.xlu0 %1386 }
0x1b13   :  { %v1389_v47 = vadd.f32 %v1387_v15, %v1379_v46 }
0x1b15   :  { %3869 = vtanh.f32 %v1389_v47  ;;  %v1488_v63 = vrot.slane %v1389_v47, 6 }
0x1b1f   :  { %v3870_v48 = vpop.eup %3869 }
0x1b20   :  { %1392 = vrot.lane.b32.xlu1 %v3870_v48, %s4160_s1 }
0x1b92   :  { %v1393_v49 = vpop.permute.xlu1 %1392 }
0x1b93   :  { %v4530_v50 = vmul.f32 %v3868_v42, %v1393_v49 }
0x1b95   :  { %v1401_v51 = vrot.slane %v4530_v50, 2 }
0x1b97   :  { %1402 = vrot.lane.b32.xlu0 %v1401_v51, %s4161_s3 }
0x1c09   :  { %v1403_v52 = vpop.permute.xlu0 %1402 }
0x1c0a   :  { %3440 = vmatmul.mubr.msk.f32.vlgmr.msra.gmra.mrb[12].mxu0 %vm219_vm3, %v1403_v52 }
0x1c0b   :  { %3693 = vmatpush3.bf16.msra.mxu0 %v4478_v59  ;;  %3461 = vmatprep.mubr.msk.f32.mxu0 %vm4158_vm0, %v4159_v1 }
0x1c0c   :  { %3694 = vmatprep.subr.bf16.mxu0 %v4157_v0 }
0x1c0f   :  { %3696 = vmatpush3.bf16.msra.mxu0 %v4481_v11 }
0x1c10   :  { %3703 = vmatprep.subr.bf16.mxu0 %v4157_v0 }
0x1cdd   :  { %v1472_v53 = vpop.f32.mrb[12].mxu0 }
0x1cde   :  { %v1477_v33 = vrot.slane %v1472_v53, 4  ;;  %v3441_v54 = vpop.f32.mrb[13].mxu0 }
0x1ce0   :  { %v1479_v55 = vadd.f32 %v1477_v33, %v4511_v18 }
0x1ce2   :  { %3871 = vtanh.f32 %v1479_v55  ;;  %v3131_v57 = vmul.f32 -1.442695, %v1479_v55 }
0x1ce4   :  { %3873 = vpow2.f32 %v3131_v57 }
0x1cec   :  { %v3872_v56 = vpop.eup %3871 }
0x1ced   :  { %1492 = vrot.lane.b32.xlu1 %v3872_v56, %s4160_s1 }
0x1cee   :  { %v3874_v58 = vpop.eup %3873 }
0x1cef   :  { %v1483_v60 = vadd.f32 1.0, %v3874_v58 }
0x1cf1   :  { %3875 = vrcp.f32 %v1483_v60 }
0x1cfb   :  { %v3876_v8 = vpop.eup %3875 }
0x1cfc   :  { %v1490_v2 = vmul.f32 %v3876_v8, %v1488_v63 }
0x1d5f   :  { %v1493_v61 = vpop.permute.xlu1 %1492 }
0x1d60   :  { %v1495_v62 = vmul.f32 %v3876_v8, %v1493_v61 }
0x1d62   :  { %1497 = vrot.lane.b32.xlu0 %v1495_v62, %s4161_s3 }
0x1dd4   :  { %v1498_v12 = vpop.permute.xlu0 %1497 }
0x1dd5   :  { %v1500_v3 = vadd.f32 %v1498_v12, %v1490_v2 }
0x1dd7   :  { %3877 = vtanh.f32 %v1500_v3  ;;  %v1599_v27 = vrot.slane %v1500_v3, 6 }
0x1de1   :  { %v3878_v4 = vpop.eup %3877 }
0x1de2   :  { %1503 = vrot.lane.b32.xlu1 %v3878_v4, %s4160_s1 }
0x1e54   :  { %v1504_v5 = vpop.permute.xlu1 %1503 }
0x1e55   :  { %v4545_v6 = vmul.f32 %v3876_v8, %v1504_v5 }
0x1e57   :  { %v1512_v7 = vrot.slane %v4545_v6, 4 }
0x1e59   :  { %1513 = vrot.lane.b32.xlu0 %v1512_v7, %s4161_s3 }
0x1ecb   :  { %v1514_v9 = vpop.permute.xlu0 %1513 }
0x1ecc   :  { %3451 = vmatmul.mubr.msk.f32.vlgmr.msra.gmra.mrb[12].mxu1 %vm219_vm3, %v1514_v9 }
0x1ecd   :  { %3699 = vmatpush3.bf16.msra.mxu1 %v4478_v59  ;;  %3472 = vmatprep.mubr.msk.f32.mxu1 %vm4158_vm0, %v4159_v1 }
0x1ece   :  { %3700 = vmatprep.subr.bf16.mxu1 %v4157_v0 }
0x1ed1   :  { %3702 = vmatpush3.bf16.msra.mxu1 %v4481_v11 }
0x1ed2   :  { %3709 = vmatprep.subr.bf16.mxu1 %v4157_v0 }
0x1f9f   :  { %v1583_v10 = vpop.f32.mrb[12].mxu1 }
0x1fa0   :  { %v1588_v13 = vrot.slane %v1583_v10, 2  ;;  %v3452_v16 = vpop.f32.mrb[13].mxu1 }
0x1fa2   :  { %v1590_v19 = vadd.f32 %v1588_v13, %v4511_v18 }
0x1fa4   :  { %3879 = vtanh.f32 %v1590_v19  ;;  %v3133_v21 = vmul.f32 -1.442695, %v1590_v19 }
0x1fa6   :  { %3881 = vpow2.f32 %v3133_v21 }
0x1fae   :  { %v3880_v20 = vpop.eup %3879 }
0x1faf   :  { %1603 = vrot.lane.b32.xlu1 %v3880_v20, %s4160_s1 }
0x1fb0   :  { %v3882_v22 = vpop.eup %3881 }
0x1fb1   :  { %v1594_v23 = vadd.f32 1.0, %v3882_v22 }
0x1fb3   :  { %3883 = vrcp.f32 %v1594_v23 }
0x1fbd   :  { %v3884_v24 = vpop.eup %3883 }
0x1fbe   :  { %v1601_v28 = vmul.f32 %v3884_v24, %v1599_v27 }
0x2021   :  { %v1604_v25 = vpop.permute.xlu1 %1603 }
0x2022   :  { %v1606_v26 = vmul.f32 %v3884_v24, %v1604_v25 }
0x2024   :  { %1608 = vrot.lane.b32.xlu0 %v1606_v26, %s4161_s3 }
0x2096   :  { %v1609_v29 = vpop.permute.xlu0 %1608 }
0x2097   :  { %v1611_v30 = vadd.f32 %v1609_v29, %v1601_v28 }
0x2099   :  { %3885 = vtanh.f32 %v1611_v30  ;;  %v1707_v45 = vrot.slane %v1611_v30, 6 }
0x20a3   :  { %v3886_v18 = vpop.eup %3885 }
0x20a4   :  { %1614 = vrot.lane.b32.xlu1 %v3886_v18, %s4160_s1 }
0x2116   :  { %v1615_v31 = vpop.permute.xlu1 %1614 }
0x2117   :  { %v4560_v17 = vmul.f32 %v3884_v24, %v1615_v31 }
0x2119   :  { %v1623_v32 = vrot.slane %v4560_v17, 6 }
0x211b   :  { %1624 = vrot.lane.b32.xlu0 %v1623_v32, %s4161_s3 }
0x218d   :  { %v1625_v34 = vpop.permute.xlu0 %1624 }
0x218e   :  { %3462 = vmatmul.mubr.msk.f32.vlgmr.msra.gmra.mrb[14].mxu0 %vm219_vm3, %v1625_v34 }
0x218f   :  { %3705 = vmatpush3.bf16.msra.mxu0 %v4478_v59  ;;  %3483 = vmatprep.mubr.msk.f32.mxu0 %vm4158_vm0, %v4159_v1 }
0x2190   :  { %3706 = vmatprep.subr.bf16.mxu0 %v4157_v0 }
0x2193   :  { %3708 = vmatpush3.bf16.msra.mxu0 %v4481_v11 }
0x2261   :  { %v1694_v35 = vpop.f32.mrb[14].mxu0 }
0x2262   :  { %v1698_v36 = vadd.f32 %v1694_v35, %v4509_v14  ;;  %v3463_v37 = vpop.f32.mrb[15].mxu0 }
0x2264   :  { %3887 = vtanh.f32 %v1698_v36  ;;  %v3135_v39 = vmul.f32 -1.442695, %v1698_v36 }
0x2266   :  { %3889 = vpow2.f32 %v3135_v39 }
0x226e   :  { %v3888_v38 = vpop.eup %3887 }
0x226f   :  { %1711 = vrot.lane.b32.xlu1 %v3888_v38, %s4160_s1 }
0x2270   :  { %v3890_v40 = vpop.eup %3889 }
0x2271   :  { %v1702_v41 = vadd.f32 1.0, %v3890_v40 }
0x2273   :  { %3891 = vrcp.f32 %v1702_v41 }
0x227d   :  { %v3892_v42 = vpop.eup %3891 }
0x227e   :  { %v1709_v46 = vmul.f32 %v3892_v42, %v1707_v45 }
0x22e1   :  { %v1712_v43 = vpop.permute.xlu1 %1711 }
0x22e2   :  { %v1714_v44 = vmul.f32 %v3892_v42, %v1712_v43 }
0x22e4   :  { %1716 = vrot.lane.b32.xlu0 %v1714_v44, %s4161_s3 }
0x2356   :  { %v1717_v15 = vpop.permute.xlu0 %1716 }
0x2357   :  { %v1719_v47 = vadd.f32 %v1717_v15, %v1709_v46 }
0x2359   :  { %3893 = vtanh.f32 %v1719_v47 }
0x2363   :  { %v3894_v48 = vpop.eup %3893 }
0x2364   :  { %1722 = vrot.lane.b32.xlu1 %v3894_v48, %s4160_s1 }
0x23d6   :  { %v1723_v49 = vpop.permute.xlu1 %1722 }
0x23d7   :  { %v1725_v51 = vmul.f32 %v3892_v42, %v1723_v49 }
0x23d9   :  { %1727 = vrot.lane.b32.xlu0 %v1725_v51, %s4161_s3 }
0x244b   :  { %v1728_v52 = vpop.permute.xlu0 %1727 }
0x244c   :  { %1730 = vst.msk [vmem:[#allocation2 + $0x8] sm:$0x3] %vm322_vm2, %v1728_v52  ;;  %3473 = vmatmul.mubr.msk.f32.vlgmr.msra.gmra.mrb[14].mxu1 %vm219_vm3, %v1728_v52 }
0x244d   :  { %3711 = vmatpush3.bf16.msra.mxu1 %v4478_v59  ;;  %3494 = vmatprep.mubr.msk.f32.mxu1 %vm4158_vm0, %v4159_v1 }
0x244e   :  { %3712 = vmatprep.subr.bf16.mxu1 %v4157_v0 }
0x2451   :  { %3714 = vmatpush3.bf16.msra.mxu1 %v4481_v11  ;;  %v1815_v11 = vrot.slane %v1719_v47, 6 }
0x2452   :  { %3723 = vmatprep.subr.bf16.mxu1 %v4157_v0 }
0x251f   :  { %v1799_v53 = vpop.f32.mrb[14].mxu1 }
0x2520   :  { %v1804_v33 = vrot.slane %v1799_v53, 6  ;;  %v3474_v54 = vpop.f32.mrb[15].mxu1 }
0x2521   :  { %v2068_v54 = vld [vmem:[%s4775_s8 + $0x8] sm:$0xff] }
0x2522   :  { %v1806_v55 = vadd.f32 %v1804_v33, %v4509_v14  ;;  %v2067_v33 = vld [vmem:[%s4775_s8] sm:$0xff] }
0x2524   :  { %3895 = vtanh.f32 %v1806_v55  ;;  %v3137_v57 = vmul.f32 -1.442695, %v1806_v55  ;;  %v2065_v55 = vld [vmem:[#allocation11 + $0x10] sm:$0xff] }
0x2526   :  { %3897 = vpow2.f32 %v3137_v57  ;;  %v2069_v57 = vld [vmem:[%s4775_s8 + $0x10] sm:$0xff] }
0x252e   :  { %v3896_v56 = vpop.eup %3895 }
0x252f   :  { %1819 = vrot.lane.b32.xlu1 %v3896_v56, %s4160_s1  ;;  %v4622_v56 = vpack.c.bf16 %v2068_v54, %v2067_v33 }
0x2530   :  { %v3898_v59 = vpop.eup %3897 }
0x2531   :  { %v1810_v58 = vadd.f32 1.0, %v3898_v59  ;;  %v2070_v59 = vld [vmem:[%s4775_s8 + $0x18] sm:$0xff] }
0x2533   :  { %3899 = vrcp.f32 %v1810_v58 }
0x253d   :  { %v3900_v60 = vpop.eup %3899 }
0x253e   :  { %v1817_v62 = vmul.f32 %v3900_v60, %v1815_v11 }
0x25a1   :  { %v1820_v8 = vpop.permute.xlu1 %1819 }
0x25a2   :  { %v1822_v61 = vmul.f32 %v3900_v60, %v1820_v8 }
0x25a4   :  { %1824 = vrot.lane.b32.xlu0 %v1822_v61, %s4161_s3 }
0x2616   :  { %v1825_v63 = vpop.permute.xlu0 %1824 }
0x2617   :  { %v1827_v2 = vadd.f32 %v1825_v63, %v1817_v62 }
0x2619   :  { %3901 = vtanh.f32 %v1827_v2  ;;  %v1926_v26 = vrot.slane %v1827_v2, 6 }
0x2623   :  { %v3902_v12 = vpop.eup %3901 }
0x2624   :  { %1830 = vrot.lane.b32.xlu1 %v3902_v12, %s4160_s1 }
0x2696   :  { %v1831_v3 = vpop.permute.xlu1 %1830 }
0x2697   :  { %v4587_v4 = vmul.f32 %v3900_v60, %v1831_v3  ;;  %v4631_v60 = vpack.c.bf16 %v2070_v59, %v2069_v57 }
0x2699   :  { %v1839_v5 = vrot.slane %v4587_v4, 2 }
0x269b   :  { %1840 = vrot.lane.b32.xlu0 %v1839_v5, %s4161_s3  ;;  %v3142_v5 = vld [vmem:[#allocation12] ss:$0 sm:$0xff] }
0x270d   :  { %v1841_v7 = vpop.permute.xlu0 %1840 }
0x270e   :  { %3484 = vmatmul.mubr.msk.f32.vlgmr.msra.gmra.mrb[16].mxu0 %vm219_vm3, %v1841_v7 }
0x27e1   :  { %v1910_v9 = vpop.f32.mrb[16].mxu0 }
0x27e2   :  { %v1915_v10 = vrot.slane %v1910_v9, 4  ;;  %v3485_v13 = vpop.f32.mrb[17].mxu0 }
0x27e4   :  { %v1917_v16 = vadd.f32 %v1915_v10, %v4509_v14 }
0x27e6   :  { %3903 = vtanh.f32 %v1917_v16  ;;  %v3139_v20 = vmul.f32 -1.442695, %v1917_v16 }
0x27e8   :  { %3905 = vpow2.f32 %v3139_v20 }
0x27f0   :  { %v3904_v19 = vpop.eup %3903 }
0x27f1   :  { %1930 = vrot.lane.b32.xlu1 %v3904_v19, %s4160_s1 }
0x27f2   :  { %v3906_v21 = vpop.eup %3905 }
0x27f3   :  { %v1921_v22 = vadd.f32 1.0, %v3906_v21 }
0x27f5   :  { %3907 = vrcp.f32 %v1921_v22 }
0x27ff   :  { %v3908_v23 = vpop.eup %3907 }
0x2800   :  { %v1928_v27 = vmul.f32 %v3908_v23, %v1926_v26 }
0x2863   :  { %v1931_v24 = vpop.permute.xlu1 %1930 }
0x2864   :  { %v1933_v25 = vmul.f32 %v3908_v23, %v1931_v24 }
0x2866   :  { %1935 = vrot.lane.b32.xlu0 %v1933_v25, %s4161_s3 }
0x28d8   :  { %v1936_v28 = vpop.permute.xlu0 %1935 }
0x28d9   :  { %v1938_v29 = vadd.f32 %v1936_v28, %v1928_v27 }
0x28db   :  { %3909 = vtanh.f32 %v1938_v29 }
0x28e5   :  { %v3910_v30 = vpop.eup %3909 }
0x28e6   :  { %1941 = vrot.lane.b32.xlu1 %v3910_v30, %s4160_s1 }
0x2958   :  { %v1942_v18 = vpop.permute.xlu1 %1941 }
0x2959   :  { %v1944_v31 = vmul.f32 %v3908_v23, %v1942_v18 }
0x295b   :  { %v1950_v32 = vrot.slane %v1944_v31, 4 }
0x295d   :  { %1951 = vrot.lane.b32.xlu0 %v1950_v32, %s4161_s3 }
0x29cf   :  { %v1952_v34 = vpop.permute.xlu0 %1951 }
0x29d0   :  { %3495 = vmatmul.mubr.msk.f32.vlgmr.msra.gmra.mrb[16].mxu1 %vm219_vm3, %v1952_v34 }
0x29d1   :  { %3516 = vmatprep.mubr.msk.f32.mxu1 %vm4158_vm0, %v4159_v1  ;;  %3725 = vmatpush3.bf16.msra.mxu1 %v4622_v56 }
0x29d2   :  { %3726 = vmatprep.subr.bf16.mxu1 %v4157_v0 }
0x29d5   :  { %3728 = vmatpush3.bf16.msra.mxu1 %v4631_v60 }
0x29d6   :  { %3735 = vmatprep.subr.bf16.mxu1 %v4157_v0 }
0x29d8   :  { %3517 = vmatmul.mubr.f32.vlgmr.msra.gmra.mrb[18].mxu1 %v4159_v1 }
0x29d9   :  { %3737 = vmatpush3.bf16.msra.mxu1 %v4622_v56  ;;  %3538 = vmatprep.mubr.msk.f32.mxu1 %vm4158_vm0, %v4159_v1 }
0x29da   :  { %3738 = vmatprep.subr.bf16.mxu1 %v4157_v0 }
0x29dd   :  { %3740 = vmatpush3.bf16.msra.mxu1 %v4631_v60 }
0x29de   :  { %3747 = vmatprep.subr.bf16.mxu1 %v4157_v0 }
0x2aa3   :  { %v2021_v35 = vpop.f32.mrb[16].mxu1 }
0x2aa4   :  { %v2026_v36 = vrot.slane %v2021_v35, 2  ;;  %v3496_v37 = vpop.f32.mrb[17].mxu1 }
0x2aa6   :  { %v2028_v38 = vadd.f32 %v2026_v36, %v4509_v14  ;;  %v2037_v14 = vrot.slane %v1938_v29, 6 }
0x2aa8   :  { %3911 = vtanh.f32 %v2028_v38  ;;  %v3141_v40 = vmul.f32 -1.442695, %v2028_v38 }
0x2aaa   :  { %3913 = vpow2.f32 %v3141_v40 }
0x2aab   :  { %v2225_v3 = vpop.f32.mrb[18].mxu1 }
0x2ab2   :  { %v3912_v39 = vpop.eup %3911 }
0x2ab3   :  { %2041 = vrot.lane.b32.xlu1 %v3912_v39, %s4160_s1 }
0x2ab4   :  { %v3914_v41 = vpop.eup %3913 }
0x2ab5   :  { %v2032_v42 = vadd.f32 1.0, %v3914_v41 }
0x2ab7   :  { %3915 = vrcp.f32 %v2032_v42 }
0x2ac1   :  { %v3916_v43 = vpop.eup %3915 }
0x2ac2   :  { %v2039_v46 = vmul.f32 %v3916_v43, %v2037_v14 }
0x2b25   :  { %v2042_v44 = vpop.permute.xlu1 %2041 }
0x2b26   :  { %v2044_v45 = vmul.f32 %v3916_v43, %v2042_v44 }
0x2b28   :  { %2046 = vrot.lane.b32.xlu0 %v2044_v45, %s4161_s3 }
0x2b2c   :  { %1397 = vrot.lane.b32.xlu0 %v4530_v50, %s4161_s3  ;;  %v2063_v50 = vld [vmem:[#allocation11] sm:$0xff] }
0x2b30   :  { %1619 = vrot.lane.b32.xlu0 %v4560_v17, %s4161_s3  ;;  %v2064_v17 = vld [vmem:[#allocation11 + $0x8] sm:$0xff] }
0x2b31   :  { %v3715_v53 = vpack.c.bf16 %v2064_v17, %v2063_v50 }
0x2b33   :  { %3716 = vmatprep.subr.bf16.mxu0 %v3715_v53 }
0x2b34   :  { %1946 = vrot.lane.b32.xlu0 %v1944_v31, %s4161_s3  ;;  %3718 = vmatpush3.bf16.msra.mxu0 %v3715_v53 }
0x2b9a   :  { %v2047_v15 = vpop.permute.xlu0 %2046 }
0x2b9b   :  { %v2049_v47 = vadd.f32 %v2047_v15, %v2039_v46 }
0x2b9d   :  { %3917 = vtanh.f32 %v2049_v47 }
0x2b9e   :  { %v1398_v48 = vpop.permute.xlu0 %1397 }
0x2b9f   :  { %1400 = vst.msk [vmem:[#allocation2] sm:$0xc] %vm431_vm4, %v1398_v48 }
0x2ba2   :  { %v1620_v49 = vpop.permute.xlu0 %1619 }
0x2ba3   :  { %1622 = vst.msk [vmem:[#allocation2] sm:$0xc0] %vm655_vm5, %v1620_v49 }
0x2ba6   :  { %v1947_v51 = vpop.permute.xlu0 %1946 }
0x2ba7   :  { %v3918_v52 = vpop.eup %3917  ;;  %1949 = vst.msk [vmem:[#allocation2 + $0x8] sm:$0x30] %vm543_vm6, %v1947_v51 }
0x2ba8   :  { %2052 = vrot.lane.b32.xlu1 %v3918_v52, %s4160_s1 }
0x2bac   :  { %1508 = vrot.lane.b32.xlu1 %v4545_v6, %s4161_s3  ;;  %v2066_v6 = vld [vmem:[#allocation11 + $0x18] sm:$0xff] }
0x2bad   :  { %v3719_v58 = vpack.c.bf16 %v2066_v6, %v2065_v55 }
0x2baf   :  { %3720 = vmatprep.subr.bf16.mxu0 %v3719_v58 }
0x2bb0   :  { %1835 = vrot.lane.b32.xlu1 %v4587_v4, %s4161_s3  ;;  %3722 = vmatpush3.bf16.msra.mxu0 %v3719_v58  ;;  %v3518_v4 = vpop.f32.mrb[19].mxu1 }
0x2bb1   :  { %3729 = vmatprep.subr.bf16.mxu0 %v4157_v0 }
0x2c1a   :  { %v2053_v8 = vpop.permute.xlu1 %2052 }
0x2c1b   :  { %v2055_v61 = vmul.f32 %v3916_v43, %v2053_v8 }
0x2c1d   :  { %2057 = vrot.lane.b32.xlu1 %v2055_v61, %s4161_s3 }
0x2c1e   :  { %v1509_v11 = vpop.permute.xlu1 %1508 }
0x2c1f   :  { %1511 = vst.msk [vmem:[#allocation2] sm:$0x30] %vm543_vm6, %v1509_v11 }
0x2c22   :  { %v1836_v62 = vpop.permute.xlu1 %1835 }
0x2c23   :  { %1838 = vst.msk [vmem:[#allocation2 + $0x8] sm:$0xc] %vm431_vm4, %v1836_v62 }
0x2c26   :  { %v2061_v63 = vld [vmem:[#allocation2] sm:$0xff] }
0x2c27   :  { %3505 = vmatprep.mubr.msk.f32.mxu0 %vm219_vm3, %v2061_v63 }
0x2c8f   :  { %v2058_v2 = vpop.permute.xlu1 %2057 }
0x2c90   :  { %2060 = vst.msk [vmem:[#allocation2 + $0x8] sm:$0xc0] %vm655_vm5, %v2058_v2 }
0x2c97   :  { %v2062_v12 = vld [vmem:[#allocation2 + $0x8] sm:$0xff] }
0x2c98   :  { %3506 = vmatmul.mubr.msk.f32.vlgmr.msra.gmra.mrb[18].mxu0 %vm219_vm3, %v2062_v12 }
0x2c99   :  { %3731 = vmatpush3.bf16.msra.mxu0 %v4622_v56  ;;  %3527 = vmatprep.mubr.msk.f32.mxu0 %vm4158_vm0, %v4159_v1 }
0x2c9a   :  { %3732 = vmatprep.subr.bf16.mxu0 %v4157_v0 }
0x2c9d   :  { %3734 = vmatpush3.bf16.msra.mxu0 %v4631_v60 }
0x2c9e   :  { %3741 = vmatprep.subr.bf16.mxu0 %v4157_v0 }
0x2d6b   :  { %v3507_v7 = vpop.f32.mrb[18].mxu0 }
0x2d6c   :  { %v4656_v9 = vadd.f32 %v3507_v7, %v3142_v5  ;;  %v2150_v10 = vpop.f32.mrb[19].mxu0 }
0x2d6d   :  { %v4658_v13 = vadd.f32 %v3142_v5, %v2150_v10 }
0x2d6f   :  { %v2229_v16 = vadd.f32 %v2225_v3, %v4658_v13 }
0x2d71   :  { %3919 = vtanh.f32 %v2229_v16  ;;  %v3145_v20 = vmul.f32 -1.442695, %v2229_v16 }
0x2d73   :  { %3921 = vpow2.f32 %v3145_v20 }
0x2d7b   :  { %v3920_v19 = vpop.eup %3919 }
0x2d7c   :  { %2239 = vrot.lane.b32.xlu0 %v3920_v19, %s4160_s1 }
0x2d7d   :  { %v3922_v21 = vpop.eup %3921 }
0x2d7e   :  { %v2233_v22 = vadd.f32 1.0, %v3922_v21 }
0x2d80   :  { %3923 = vrcp.f32 %v2233_v22 }
0x2d8a   :  { %v3924_v23 = vpop.eup %3923 }
0x2d8b   :  { %v2237_v26 = vmul.f32 0.0, %v3924_v23 }
0x2dee   :  { %v2240_v24 = vpop.permute.xlu0 %2239 }
0x2def   :  { %v2242_v25 = vmul.f32 %v3924_v23, %v2240_v24 }
0x2df1   :  { %2244 = vrot.lane.b32.xlu1 %v2242_v25, %s4161_s3 }
0x2e63   :  { %v2245_v27 = vpop.permute.xlu1 %2244 }
0x2e64   :  { %v2247_v28 = vadd.f32 %v2245_v27, %v2237_v26 }
0x2e66   :  { %3925 = vtanh.f32 %v2247_v28  ;;  %v2341_v44 = vrot.slane %v2247_v28, 6 }
0x2e70   :  { %v3926_v29 = vpop.eup %3925 }
0x2e71   :  { %2250 = vrot.lane.b32.xlu0 %v3926_v29, %s4160_s1 }
0x2ee3   :  { %v2251_v30 = vpop.permute.xlu0 %2250 }
0x2ee4   :  { %v2253_v18 = vmul.f32 %v3924_v23, %v2251_v30 }
0x2ee6   :  { %2255 = vrot.lane.b32.xlu1 %v2253_v18, %s4161_s3 }
0x2f58   :  { %v2256_v31 = vpop.permute.xlu1 %2255 }
0x2f59   :  { %3528 = vmatmul.mubr.msk.f32.vlgmr.msra.gmra.mrb[20].mxu0 %vm219_vm3, %v2256_v31 }
0x2f5a   :  { %3743 = vmatpush3.bf16.msra.mxu0 %v4622_v56  ;;  %3549 = vmatprep.mubr.msk.f32.mxu0 %vm4158_vm0, %v4159_v1 }
0x2f5b   :  { %3744 = vmatprep.subr.bf16.mxu0 %v4157_v0 }
0x2f5e   :  { %3746 = vmatpush3.bf16.msra.mxu0 %v4631_v60 }
0x2f5f   :  { %3753 = vmatprep.subr.bf16.mxu0 %v4157_v0 }
0x302c   :  { %v2325_v32 = vpop.f32.mrb[20].mxu0 }
0x302d   :  { %v2330_v34 = vrot.slane %v2325_v32, 6  ;;  %v3529_v35 = vpop.f32.mrb[21].mxu0 }
0x302f   :  { %v2332_v36 = vadd.f32 %v2330_v34, %v4658_v13 }
0x3031   :  { %3927 = vtanh.f32 %v2332_v36  ;;  %v3147_v38 = vmul.f32 -1.442695, %v2332_v36 }
0x3033   :  { %3929 = vpow2.f32 %v3147_v38 }
0x303b   :  { %v3928_v37 = vpop.eup %3927 }
0x303c   :  { %2345 = vrot.lane.b32.xlu0 %v3928_v37, %s4160_s1 }
0x303d   :  { %v3930_v39 = vpop.eup %3929 }
0x303e   :  { %v2336_v40 = vadd.f32 1.0, %v3930_v39 }
0x3040   :  { %3931 = vrcp.f32 %v2336_v40 }
0x304a   :  { %v3932_v41 = vpop.eup %3931 }
0x304b   :  { %v2343_v45 = vmul.f32 %v3932_v41, %v2341_v44 }
0x30ae   :  { %v2346_v42 = vpop.permute.xlu0 %2345 }
0x30af   :  { %v2348_v43 = vmul.f32 %v3932_v41, %v2346_v42 }
0x30b1   :  { %2350 = vrot.lane.b32.xlu1 %v2348_v43, %s4161_s3 }
0x3123   :  { %v2351_v14 = vpop.permute.xlu1 %2350 }
0x3124   :  { %v2353_v46 = vadd.f32 %v2351_v14, %v2343_v45 }
0x3126   :  { %3933 = vtanh.f32 %v2353_v46  ;;  %v2448_v8 = vrot.slane %v2353_v46, 6 }
0x3130   :  { %v3934_v15 = vpop.eup %3933 }
0x3131   :  { %2356 = vrot.lane.b32.xlu0 %v3934_v15, %s4160_s1 }
0x31a3   :  { %v2357_v47 = vpop.permute.xlu0 %2356 }
0x31a4   :  { %v2359_v48 = vmul.f32 %v3932_v41, %v2357_v47 }
0x31a6   :  { %v2361_v49 = vrot.slane %v2359_v48, 2 }
0x31a8   :  { %2362 = vrot.lane.b32.xlu1 %v2361_v49, %s4161_s3 }
0x321a   :  { %v2363_v51 = vpop.permute.xlu1 %2362 }
0x321b   :  { %3539 = vmatmul.mubr.msk.f32.vlgmr.msra.gmra.mrb[20].mxu1 %vm219_vm3, %v2363_v51 }
0x321c   :  { %3749 = vmatpush3.bf16.msra.mxu1 %v4622_v56  ;;  %3560 = vmatprep.mubr.msk.f32.mxu1 %vm4158_vm0, %v4159_v1 }
0x321d   :  { %3750 = vmatprep.subr.bf16.mxu1 %v4157_v0 }
0x3220   :  { %3752 = vmatpush3.bf16.msra.mxu1 %v4631_v60 }
0x3221   :  { %3759 = vmatprep.subr.bf16.mxu1 %v4157_v0 }
0x32ee   :  { %v2432_v52 = vpop.f32.mrb[20].mxu1 }
0x32ef   :  { %v2437_v50 = vrot.slane %v2432_v52, 4  ;;  %v3540_v17 = vpop.f32.mrb[21].mxu1 }
0x32f1   :  { %v2439_v53 = vadd.f32 %v2437_v50, %v4658_v13 }
0x32f3   :  { %3935 = vtanh.f32 %v2439_v53  ;;  %v3149_v54 = vmul.f32 -1.442695, %v2439_v53 }
0x32f5   :  { %3937 = vpow2.f32 %v3149_v54 }
0x32fd   :  { %v3936_v33 = vpop.eup %3935 }
0x32fe   :  { %2452 = vrot.lane.b32.xlu0 %v3936_v33, %s4160_s1 }
0x32ff   :  { %v3938_v55 = vpop.eup %3937 }
0x3300   :  { %v2443_v6 = vadd.f32 1.0, %v3938_v55 }
0x3302   :  { %3939 = vrcp.f32 %v2443_v6 }
0x330c   :  { %v3940_v57 = vpop.eup %3939 }
0x330d   :  { %v2450_v61 = vmul.f32 %v3940_v57, %v2448_v8 }
0x3370   :  { %v2453_v59 = vpop.permute.xlu0 %2452 }
0x3371   :  { %v2455_v58 = vmul.f32 %v3940_v57, %v2453_v59 }
0x3373   :  { %2457 = vrot.lane.b32.xlu1 %v2455_v58, %s4161_s3 }
0x33e5   :  { %v2458_v11 = vpop.permute.xlu1 %2457 }
0x33e6   :  { %v2460_v62 = vadd.f32 %v2458_v11, %v2450_v61 }
0x33e8   :  { %3941 = vtanh.f32 %v2460_v62  ;;  %v2555_v26 = vrot.slane %v2460_v62, 6 }
0x33f2   :  { %v3942_v63 = vpop.eup %3941 }
0x33f3   :  { %2463 = vrot.lane.b32.xlu0 %v3942_v63, %s4160_s1 }
0x3465   :  { %v2464_v2 = vpop.permute.xlu0 %2463 }
0x3466   :  { %v2466_v12 = vmul.f32 %v3940_v57, %v2464_v2 }
0x3468   :  { %v2468_v3 = vrot.slane %v2466_v12, 4 }
0x346a   :  { %2469 = vrot.lane.b32.xlu1 %v2468_v3, %s4161_s3 }
0x34dc   :  { %v2470_v4 = vpop.permute.xlu1 %2469 }
0x34dd   :  { %3550 = vmatmul.mubr.msk.f32.vlgmr.msra.gmra.mrb[22].mxu0 %vm219_vm3, %v2470_v4 }
0x34de   :  { %3755 = vmatpush3.bf16.msra.mxu0 %v4622_v56  ;;  %3571 = vmatprep.mubr.msk.f32.mxu0 %vm4158_vm0, %v4159_v1 }
0x34df   :  { %3756 = vmatprep.subr.bf16.mxu0 %v4157_v0 }
0x34e2   :  { %3758 = vmatpush3.bf16.msra.mxu0 %v4631_v60 }
0x34e3   :  { %3765 = vmatprep.subr.bf16.mxu0 %v4157_v0 }
0x35b0   :  { %v2539_v5 = vpop.f32.mrb[22].mxu0 }
0x35b1   :  { %v2544_v7 = vrot.slane %v2539_v5, 2  ;;  %v3551_v10 = vpop.f32.mrb[23].mxu0 }
0x35b3   :  { %v2546_v16 = vadd.f32 %v2544_v7, %v4658_v13 }
0x35b5   :  { %3943 = vtanh.f32 %v2546_v16  ;;  %v3151_v20 = vmul.f32 -1.442695, %v2546_v16 }
0x35b7   :  { %3945 = vpow2.f32 %v3151_v20 }
0x35bf   :  { %v3944_v19 = vpop.eup %3943 }
0x35c0   :  { %2559 = vrot.lane.b32.xlu0 %v3944_v19, %s4160_s1 }
0x35c1   :  { %v3946_v21 = vpop.eup %3945 }
0x35c2   :  { %v2550_v22 = vadd.f32 1.0, %v3946_v21 }
0x35c4   :  { %3947 = vrcp.f32 %v2550_v22 }
0x35ce   :  { %v3948_v23 = vpop.eup %3947 }
0x35cf   :  { %v2557_v27 = vmul.f32 %v3948_v23, %v2555_v26 }
0x3632   :  { %v2560_v24 = vpop.permute.xlu0 %2559 }
0x3633   :  { %v2562_v25 = vmul.f32 %v3948_v23, %v2560_v24 }
0x3635   :  { %2564 = vrot.lane.b32.xlu1 %v2562_v25, %s4161_s3 }
0x36a7   :  { %v2565_v28 = vpop.permute.xlu1 %2564 }
0x36a8   :  { %v2567_v29 = vadd.f32 %v2565_v28, %v2557_v27 }
0x36aa   :  { %3949 = vtanh.f32 %v2567_v29  ;;  %v2659_v44 = vrot.slane %v2567_v29, 6 }
0x36b4   :  { %v3950_v13 = vpop.eup %3949 }
0x36b5   :  { %2570 = vrot.lane.b32.xlu0 %v3950_v13, %s4160_s1 }
0x3727   :  { %v2571_v30 = vpop.permute.xlu0 %2570 }
0x3728   :  { %v2573_v18 = vmul.f32 %v3948_v23, %v2571_v30 }
0x372a   :  { %v2575_v31 = vrot.slane %v2573_v18, 6 }
0x372c   :  { %2576 = vrot.lane.b32.xlu1 %v2575_v31, %s4161_s3 }
0x379e   :  { %v2577_v32 = vpop.permute.xlu1 %2576 }
0x379f   :  { %3561 = vmatmul.mubr.msk.f32.vlgmr.msra.gmra.mrb[22].mxu1 %vm219_vm3, %v2577_v32 }
0x37a0   :  { %3761 = vmatpush3.bf16.msra.mxu1 %v4622_v56  ;;  %3582 = vmatprep.mubr.msk.f32.mxu1 %vm4158_vm0, %v4159_v1 }
0x37a1   :  { %3762 = vmatprep.subr.bf16.mxu1 %v4157_v0 }
0x37a4   :  { %3764 = vmatpush3.bf16.msra.mxu1 %v4631_v60 }
0x37a5   :  { %3771 = vmatprep.subr.bf16.mxu1 %v4157_v0 }
0x3872   :  { %v2646_v34 = vpop.f32.mrb[22].mxu1 }
0x3873   :  { %v2650_v35 = vadd.f32 %v2646_v34, %v4656_v9  ;;  %v3562_v36 = vpop.f32.mrb[23].mxu1 }
0x3875   :  { %3951 = vtanh.f32 %v2650_v35  ;;  %v3153_v38 = vmul.f32 -1.442695, %v2650_v35 }
0x3877   :  { %3953 = vpow2.f32 %v3153_v38 }
0x387f   :  { %v3952_v37 = vpop.eup %3951 }
0x3880   :  { %2663 = vrot.lane.b32.xlu0 %v3952_v37, %s4160_s1 }
0x3881   :  { %v3954_v39 = vpop.eup %3953 }
0x3882   :  { %v2654_v40 = vadd.f32 1.0, %v3954_v39 }
0x3884   :  { %3955 = vrcp.f32 %v2654_v40 }
0x388e   :  { %v3956_v41 = vpop.eup %3955 }
0x388f   :  { %v2661_v45 = vmul.f32 %v3956_v41, %v2659_v44 }
0x38f2   :  { %v2664_v42 = vpop.permute.xlu0 %2663 }
0x38f3   :  { %v2666_v43 = vmul.f32 %v3956_v41, %v2664_v42 }
0x38f5   :  { %2668 = vrot.lane.b32.xlu1 %v2666_v43, %s4161_s3 }
0x3967   :  { %v2669_v14 = vpop.permute.xlu1 %2668 }
0x3968   :  { %v2671_v46 = vadd.f32 %v2669_v14, %v2661_v45  ;;  %v2999_v45 = vld [vmem:[%s4777_s10 + $0x8] sm:$0xff]  ;;  %v3000_v14 = vld [vmem:[%s4777_s10 + $0x10] sm:$0xff] }
0x396a   :  { %3957 = vtanh.f32 %v2671_v46 }
0x3974   :  { %v3958_v15 = vpop.eup %3957 }
0x3975   :  { %2674 = vrot.lane.b32.xlu0 %v3958_v15, %s4160_s1  ;;  %v3001_v15 = vld [vmem:[%s4777_s10 + $0x18] sm:$0xff] }
0x39e7   :  { %v2675_v47 = vpop.permute.xlu0 %2674 }
0x39e8   :  { %v2677_v48 = vmul.f32 %v3956_v41, %v2675_v47  ;;  %v3775_v47 = vpack.c.bf16 %v3001_v15, %v3000_v14 }
0x39ea   :  { %2679 = vrot.lane.b32.xlu1 %v2677_v48, %s4161_s3 }
0x3a5c   :  { %v2680_v49 = vpop.permute.xlu1 %2679 }
0x3a5d   :  { %3572 = vmatmul.mubr.msk.f32.vlgmr.msra.gmra.mrb[24].mxu0 %vm219_vm3, %v2680_v49 }
0x3a5e   :  { %3767 = vmatpush3.bf16.msra.mxu0 %v4622_v56  ;;  %3593 = vmatprep.mubr.msk.f32.mxu0 %vm4158_vm0, %v4159_v1 }
0x3a5f   :  { %3768 = vmatprep.subr.bf16.mxu0 %v4157_v0 }
0x3a62   :  { %3770 = vmatpush3.bf16.msra.mxu0 %v4631_v60  ;;  %v2765_v60 = vrot.slane %v2671_v46, 6 }
0x3b30   :  { %v2749_v51 = vpop.f32.mrb[24].mxu0 }
0x3b31   :  { %v2754_v52 = vrot.slane %v2749_v51, 6  ;;  %v3573_v50 = vpop.f32.mrb[25].mxu0 }
0x3b33   :  { %v2756_v17 = vadd.f32 %v2754_v52, %v4656_v9 }
0x3b35   :  { %3959 = vtanh.f32 %v2756_v17  ;;  %v3155_v33 = vmul.f32 -1.442695, %v2756_v17  ;;  %v3160_v17 = vld [vmem:[%s4778_s11] ss:$0 sm:$0xff] }
0x3b37   :  { %3961 = vpow2.f32 %v3155_v33 }
0x3b3f   :  { %v3960_v53 = vpop.eup %3959 }
0x3b40   :  { %2769 = vrot.lane.b32.xlu0 %v3960_v53, %s4160_s1 }
0x3b41   :  { %v3962_v54 = vpop.eup %3961 }
0x3b42   :  { %v2760_v56 = vadd.f32 1.0, %v3962_v54 }
0x3b44   :  { %3963 = vrcp.f32 %v2760_v56 }
0x3b4e   :  { %v3964_v55 = vpop.eup %3963 }
0x3b4f   :  { %v2767_v59 = vmul.f32 %v3964_v55, %v2765_v60 }
0x3bb2   :  { %v2770_v6 = vpop.permute.xlu0 %2769 }
0x3bb3   :  { %v2772_v57 = vmul.f32 %v3964_v55, %v2770_v6 }
0x3bb5   :  { %2774 = vrot.lane.b32.xlu1 %v2772_v57, %s4161_s3 }
0x3c27   :  { %v2775_v58 = vpop.permute.xlu1 %2774 }
0x3c28   :  { %v2777_v8 = vadd.f32 %v2775_v58, %v2767_v59 }
0x3c2a   :  { %3965 = vtanh.f32 %v2777_v8 }
0x3c34   :  { %v3966_v61 = vpop.eup %3965 }
0x3c35   :  { %2780 = vrot.lane.b32.xlu0 %v3966_v61, %s4160_s1 }
0x3ca7   :  { %v2781_v11 = vpop.permute.xlu0 %2780 }
0x3ca8   :  { %v2783_v62 = vmul.f32 %v3964_v55, %v2781_v11 }
0x3caa   :  { %v2785_v63 = vrot.slane %v2783_v62, 2 }
0x3cac   :  { %2786 = vrot.lane.b32.xlu1 %v2785_v63, %s4161_s3 }
0x3d1e   :  { %v2787_v2 = vpop.permute.xlu1 %2786 }
0x3d1f   :  { %3583 = vmatmul.mubr.msk.f32.vlgmr.msra.gmra.mrb[24].mxu1 %vm219_vm3, %v2787_v2 }
0x3d20   :  { %3604 = vmatprep.mubr.msk.f32.mxu1 %vm4158_vm0, %v4159_v1  ;;  %v2872_v1 = vrot.slane %v2777_v8, 6 }
0x3df2   :  { %v2856_v12 = vpop.f32.mrb[24].mxu1 }
0x3df3   :  { %v2861_v3 = vrot.slane %v2856_v12, 4  ;;  %v3584_v4 = vpop.f32.mrb[25].mxu1 }
0x3df5   :  { %v2863_v5 = vadd.f32 %v2861_v3, %v4656_v9 }
0x3df7   :  { %3967 = vtanh.f32 %v2863_v5  ;;  %v3157_v10 = vmul.f32 -1.442695, %v2863_v5 }
0x3df9   :  { %3969 = vpow2.f32 %v3157_v10 }
0x3e01   :  { %v3968_v7 = vpop.eup %3967 }
0x3e02   :  { %2876 = vrot.lane.b32.xlu0 %v3968_v7, %s4160_s1 }
0x3e03   :  { %v3970_v16 = vpop.eup %3969 }
0x3e04   :  { %v2867_v19 = vadd.f32 1.0, %v3970_v16 }
0x3e06   :  { %3971 = vrcp.f32 %v2867_v19 }
0x3e10   :  { %v3972_v20 = vpop.eup %3971 }
0x3e11   :  { %v2874_v23 = vmul.f32 %v3972_v20, %v2872_v1 }
0x3e74   :  { %v2877_v21 = vpop.permute.xlu0 %2876 }
0x3e75   :  { %v2879_v22 = vmul.f32 %v3972_v20, %v2877_v21 }
0x3e77   :  { %2881 = vrot.lane.b32.xlu1 %v2879_v22, %s4161_s3 }
0x3ee9   :  { %v2882_v24 = vpop.permute.xlu1 %2881 }
0x3eea   :  { %v2884_v25 = vadd.f32 %v2882_v24, %v2874_v23 }
0x3eec   :  { %3973 = vtanh.f32 %v2884_v25  ;;  %v2979_v41 = vrot.slane %v2884_v25, 6 }
0x3ef6   :  { %v3974_v26 = vpop.eup %3973 }
0x3ef7   :  { %2887 = vrot.lane.b32.xlu0 %v3974_v26, %s4160_s1 }
0x3f69   :  { %v2888_v27 = vpop.permute.xlu0 %2887 }
0x3f6a   :  { %v2890_v28 = vmul.f32 %v3972_v20, %v2888_v27 }
0x3f6c   :  { %v2892_v29 = vrot.slane %v2890_v28, 4 }
0x3f6e   :  { %2893 = vrot.lane.b32.xlu1 %v2892_v29, %s4161_s3 }
0x3fe0   :  { %v2894_v13 = vpop.permute.xlu1 %2893 }
0x3fe1   :  { %3594 = vmatmul.mubr.msk.f32.vlgmr.msra.gmra.mrb[26].mxu0 %vm219_vm3, %v2894_v13 }
0x40b4   :  { %v2963_v30 = vpop.f32.mrb[26].mxu0 }
0x40b5   :  { %v2968_v18 = vrot.slane %v2963_v30, 2  ;;  %v3595_v31 = vpop.f32.mrb[27].mxu0 }
0x40b7   :  { %v2970_v32 = vadd.f32 %v2968_v18, %v4656_v9  ;;  %v2998_v9 = vld [vmem:[%s4777_s10] sm:$0xff]  ;;  %s4162_s10 = smov [#allocation14]  }
0x40b8   :  { %v3772_v46 = vpack.c.bf16 %v2999_v45, %v2998_v9  ;;  %s3094_s5 = sshll.u32 %s4162_s10, 4  ;;  %s3095_s5 = int_to_ptr.vmem [resolvable:$true] %s3094_s5 }
0x40b9   :  { %3975 = vtanh.f32 %v2970_v32  ;;  %v3159_v35 = vmul.f32 -1.442695, %v2970_v32  ;;  %s4117_s24 = scalar_lea.vmem %s3095_s5, 32  ;;  %p4122_p7 = scmp.lt.s32.totalorder %s3095_s5, %s3095_s5 }
0x40ba   :  { %3773 = vmatpush3.bf16.msra.mxu1 %v3772_v46  ;;  %p4118_p6 = scmp.ne.s32.totalorder %s3095_s5, %s4117_s24  ;;  %p4123_p8 = scmp.lt.s32.totalorder %s4117_s24, %s4117_s24 }
0x40bb   :  { %3977 = vpow2.f32 %v3159_v35  ;;  %3774 = vmatprep.subr.bf16.mxu1 %v4157_v0 }
0x40bc   :  { %p4124_p9 = por %p4123_p8, %p4122_p7 }
0x40be   :  { %3776 = vmatpush3.bf16.msra.mxu1 %v3775_v47  ;;  %p4125_p10 = pnand %p4124_p9, %p4118_p6 }
0x40c3   :  { %v3976_v34 = vpop.eup %3975 }
0x40c4   :  { %2983 = vrot.lane.b32.xlu0 %v3976_v34, %s4160_s1 }
0x40c5   :  { %v3978_v36 = vpop.eup %3977 }
0x40c6   :  { %v2974_v37 = vadd.f32 1.0, %v3978_v36 }
0x40c8   :  { %3979 = vrcp.f32 %v2974_v37 }
0x40d2   :  { %v3980_v38 = vpop.eup %3979 }
0x40d3   :  { %v2981_v42 = vmul.f32 %v3980_v38, %v2979_v41 }
0x4136   :  { %v2984_v39 = vpop.permute.xlu0 %2983 }
0x4137   :  { %v2986_v40 = vmul.f32 %v3980_v38, %v2984_v39 }
0x4139   :  { %2988 = vrot.lane.b32.xlu1 %v2986_v40, %s4161_s3 }
0x41ab   :  { %v2989_v43 = vpop.permute.xlu1 %2988 }
0x41ac   :  { %v2991_v44 = vadd.f32 %v2989_v43, %v2981_v42 }
0x41ae   :  { %3981 = vtanh.f32 %v2991_v44 }
0x41b8   :  { %v3982_v48 = vpop.eup %3981 }
0x41b9   :  { %2994 = vrot.lane.b32.xlu0 %v3982_v48, %s4160_s1 }
0x422b   :  { %v2995_v49 = vpop.permute.xlu0 %2994 }
0x422c   :  { %v2997_v51 = vmul.f32 %v3980_v38, %v2995_v49 }
0x422e   :  { %v3010_v52 = vrot.slane %v2997_v51, 6 }
0x4230   :  { %3011 = vrot.lane.b32.xlu1 %v3010_v52, %s4161_s3 }
0x42a2   :  { %v3012_v50 = vpop.permute.xlu1 %3011 }
0x42a3   :  { %3605 = vmatmul.mubr.msk.f32.vlgmr.msra.gmra.mrb[26].mxu1 %vm219_vm3, %v3012_v50 }
0x4376   :  { %v3081_v53 = vpop.f32.mrb[26].mxu1 }
0x4377   :  { %v3082_v33 = vadd.f32 %v3160_v17, %v3081_v53  ;;  %v3606_v54 = vpop.f32.mrb[27].mxu1 }
0x4379   :  { %3983 = vtanh.f32 %v3082_v33 }
0x4383   :  { %v3984_v0 = vpop.eup %3983 }
0x4384   :  { %3087 = vst.msk [vmem:[#allocation14] sm:$0x3] %vm3086_vm7, %v3984_v0 }
0x4385   :  { %4128 = shalt.err (!%p4125_p10)
}
0x4386   :  { %s4129_s11 = scalar_lea.hbm %s4779_s12, 32 }
0x4387   :  { %p4130_p11 = scmp.ne.s32.totalorder %s4779_s12, %s4129_s11  ;;  %p4133_p12 = scmp.lt.u32.totalorder %s4129_s11, %s4779_s12 }
0x4389   :  { %p4135_p13 = pnand %p4133_p12, %p4130_p11 }
0x438b   :  { %4138 = shalt.err (!%p4135_p13)
}
0x438c   :  { %3097 = dma.vmem_to_hbm [thread:$0]  %s3095_s5, 32, %s4779_s12, [#allocation5]  }
0x438d   :  { %4147 = dma.done.wait [#allocation5], 32  }
0x438e   :  { %4148 = vsyncadd [#allocation5], 4294967264 }
0x438f   :  { %3101 = vsyncpa [#allocation4], 1 }
0x4390   :  { %3102 = vsyncpa [#allocation7], 1 }
0x4391   :  { %3103 = vsyncpa [#allocation10], 1 }
0x4392   :  { %3104 = vsyncpa [#allocation13], 1 }
0x4393   :  { %3105 = vsyncpa [#allocation5], 1 }

</bundles_post_ra>
